<compile_context>
chip_gen: v5e
topology: v5e:2x2
jax: 0.10.0
libtpu: 0.0.40
codegen_flags: <defaults>
</compile_context>

<pallas_src>
import jax
import jax.numpy as jnp
import numpy as np
from jax.experimental import pallas as pl
from jax.experimental.pallas import tpu as pltpu


# ---------------------------------------------------------------------------
# Pallas kernel: one grid step == one batch tile; the full time recurrence
# runs inside the kernel with h/c carried in registers.
# ---------------------------------------------------------------------------
def encoder_kernel(
    data_ref,    # (BB, T*N)  VMEM  lane-dense flattened input tile
    w_ih_ref,    # (N, 4H)    VMEM  LSTM weight_ih, pre-transposed
    w_hh_ref,    # (H, 4H)    VMEM  LSTM weight_hh, pre-transposed
    b_ref,       # (1, 4H)    VMEM  LSTM bias (b_ih + b_hh)
    wa_hc_ref,   # (1, 2H)    VMEM  attn_linear weight, hidden||cell part
    wa_tb_ref,   # (T+1,)     SMEM  [attn weight time part (T), attn bias (1)]
    out_w_ref,   # (BB, T*N)  VMEM  weighted inputs (lane-dense)
    out_e_ref,   # (BB, T*H)  VMEM  encoded hidden states (lane-dense)
):
    BB = data_ref.shape[0]
    N = w_ih_ref.shape[0]
    H = w_hh_ref.shape[0]
    T = data_ref.shape[-1] // N

    # ---- loop-invariant loads (hoisted once; no per-step re-broadcast) ----
    w_ih_t = w_ih_ref[...]                          # (N, 4H)
    w_hh_t = w_hh_ref[...]                          # (H, 4H)
    bias = b_ref[...]                               # (1, 4H)
    wa_h = wa_hc_ref[:, :H]                         # (1, H)
    wa_c = wa_hc_ref[:, H:]                         # (1, H)

    # Time-invariant attention data term, computed on data already resident in
    # VMEM (replaces the wrapper-side einsum that re-read the input from HBM):
    #   base[b, n] = sum_t data[b, t, n] * wa_t[t] + ba
    base = data_ref[:, 0:N] * wa_tb_ref[0] + wa_tb_ref[T]        # (BB, N)
    for t in range(1, T):
        base = base + data_ref[:, t * N:(t + 1) * N] * wa_tb_ref[t]

    h = jnp.zeros((BB, H), jnp.float32)
    c = jnp.zeros((BB, H), jnp.float32)

    # T is a static module hyperparameter -> fully unrolled loop: every slice
    # below is static and h/c stay in vregs.  (For T > ~16 switch to a partially
    # unrolled lax.fori_loop to bound vreg live ranges / compile time.)
    for t in range(T):
        # Attention scores over the N input features.  (B,1)-wide h/c
        # projections are VPU multiplies + a lane reduce (off the MXU).
        s_hc = jnp.sum(h * wa_h + c * wa_c, axis=-1, keepdims=True)  # (BB, 1)
        scores = base + s_hc                                         # (BB, N)
        scores = scores - jnp.max(scores, axis=-1, keepdims=True)
        p = jnp.exp(scores)
        denom = jnp.sum(p, axis=-1, keepdims=True)                   # (BB, 1)

        x_t = data_ref[:, t * N:(t + 1) * N]                         # (BB, N)
        px = p * x_t                                                 # unnormalized weighted input

        # Push the MXU dots on the unnormalized product immediately; the exact
        # reciprocal (kept exact for the 1e-5 tolerance) runs on the EUP in
        # parallel, and the normalization is applied to the 4H-wide result.
        g_x = jnp.dot(px, w_ih_t, preferred_element_type=jnp.float32)   # (BB, 4H)
        g_h = jnp.dot(h, w_hh_t, preferred_element_type=jnp.float32)    # (BB, 4H)
        inv = pl.reciprocal(denom, approx=False)                         # (BB, 1)

        gates = g_x * inv + g_h + bias                               # (BB, 4H)
        # PyTorch LSTM gate order: i, f, g, o
        i_g = jax.nn.sigmoid(gates[:, 0:H])
        f_g = jax.nn.sigmoid(gates[:, H:2 * H])
        g_g = jnp.tanh(gates[:, 2 * H:3 * H])
        o_g = jax.nn.sigmoid(gates[:, 3 * H:4 * H])
        c = f_g * c + i_g * g_g
        h = o_g * jnp.tanh(c)

        # Stores land in the VMEM-resident output tiles; the HBM writeback of
        # the lane-dense (BB, T*feat) blocks happens once per grid step.
        out_w_ref[:, t * N:(t + 1) * N] = px * inv
        out_e_ref[:, t * H:(t + 1) * H] = h


# ---------------------------------------------------------------------------
# Wrapper
# ---------------------------------------------------------------------------
def encoder_pallas(data, w_ih, w_hh, b_comb, wa, ba):
    """data: (B, T, N) float32; wa: (2H+T,), ba: scalar. Returns (weighted, encoded)."""
    B, T, N = data.shape
    H = w_hh.shape[1]

    # ---- batch tile selection -------------------------------------------
    # Largest multiple of 8 up to 128; when the batch allows, shrink so the
    # "parallel" batch grid has length >= 2 (both TensorCores busy on v7x).
    B8 = -(-B // 8) * 8
    BB = min(128, B8)
    if B8 >= 16 and (B8 // BB) < 2:
        BB = max(8, min(BB, ((B8 // 2 + 7) // 8) * 8))
    B_pad = -(-B // BB) * BB

    data = data.astype(jnp.float32)
    if B_pad != B:
        data = jnp.pad(data, ((0, B_pad - B), (0, 0), (0, 0)))

    data_flat = data.reshape(B_pad, T * N)                     # lane-dense, free reshape
    w_ih_t = jnp.transpose(w_ih).astype(jnp.float32)           # (N, 4H)
    w_hh_t = jnp.transpose(w_hh).astype(jnp.float32)           # (H, 4H)
    b2 = b_comb.reshape(1, 4 * H).astype(jnp.float32)
    wa_hc = wa[: 2 * H].reshape(1, 2 * H).astype(jnp.float32)  # attn weight (h || c)
    wa_tb = jnp.concatenate(
        [wa[2 * H:], jnp.reshape(ba, (1,))]
    ).astype(jnp.float32)                                       # (T+1,) = [wa_t..., ba]

    # VMEM budget computed from the actual double-buffered block footprint
    # (instead of blanket-reserving 32 MiB).
    block_bytes = 4 * (
        2 * BB * T * N          # data in + weighted out
        + BB * T * H            # encoded out
        + N * 4 * H + H * 4 * H + 4 * H + 2 * H
    )
    vmem_limit = int(min(64 * 1024 * 1024, max(4 * 1024 * 1024, 4 * block_bytes)))

    grid_spec = pltpu.PrefetchScalarGridSpec(
        num_scalar_prefetch=0,
        grid=(B_pad // BB,),                                    # batch tiles only
        in_specs=[
            pl.BlockSpec((BB, T * N), lambda i: (i, 0)),        # flattened input
            pl.BlockSpec((N, 4 * H), lambda i: (0, 0)),         # w_ih^T
            pl.BlockSpec((H, 4 * H), lambda i: (0, 0)),         # w_hh^T
            pl.BlockSpec((1, 4 * H), lambda i: (0, 0)),         # lstm bias
            pl.BlockSpec((1, 2 * H), lambda i: (0, 0)),         # attn weight (h||c)
            pl.BlockSpec(memory_space=pltpu.MemorySpace.SMEM),  # [wa_t, ba] scalars
        ],
        out_specs=[
            pl.BlockSpec((BB, T * N), lambda i: (i, 0)),
            pl.BlockSpec((BB, T * H), lambda i: (i, 0)),
        ],
    )

    out_w_flat, out_e_flat = pl.pallas_call(
        encoder_kernel,
        out_shape=(
            jax.ShapeDtypeStruct((B_pad, T * N), jnp.float32),
            jax.ShapeDtypeStruct((B_pad, T * H), jnp.float32),
        ),
        grid_spec=grid_spec,
        compiler_params=pltpu.CompilerParams(
            dimension_semantics=("parallel",),    # batch tiles -> both TCs on v7x
            vmem_limit_bytes=vmem_limit,
        ),
    )(data_flat, w_ih_t, w_hh_t, b2, wa_hc, wa_tb)

    out_w = out_w_flat.reshape(B_pad, T, N)[:B]       # (B, T, N) == input_weighted
    out_e = out_e_flat.reshape(B_pad, T, H)[:B]       # (B, T, H) == input_encoded
    return out_w, out_e


# ---------------------------------------------------------------------------
# Pure-JAX reference (mirrors the PyTorch forward exactly)
# ---------------------------------------------------------------------------
def encoder_ref(data, w_ih, w_hh, b_comb, wa, ba):
    B, T, N = data.shape
    H = w_hh.shape[1]
    h = jnp.zeros((B, H), jnp.float32)
    c = jnp.zeros((B, H), jnp.float32)
    wa_h, wa_c, wa_t = wa[:H], wa[H:2 * H], wa[2 * H:]
    out_w, out_e = [], []
    for t in range(T):
        scores = (
            jnp.einsum("btn,t->bn", data, wa_t)
            + (h @ wa_h)[:, None]
            + (c @ wa_c)[:, None]
            + ba
        )
        attn = jax.nn.softmax(scores, axis=-1)
        weighted = attn * data[:, t, :]
        gates = weighted @ w_ih.T + h @ w_hh.T + b_comb
        i = jax.nn.sigmoid(gates[:, :H])
        f = jax.nn.sigmoid(gates[:, H:2 * H])
        g = jnp.tanh(gates[:, 2 * H:3 * H])
        o = jax.nn.sigmoid(gates[:, 3 * H:4 * H])
        c = f * c + i * g
        h = o * jnp.tanh(c)
        out_w.append(weighted)
        out_e.append(h)
    return jnp.stack(out_w, axis=1), jnp.stack(out_e, axis=1)


# ---------------------------------------------------------------------------
if __name__ == "__main__":
    # Sizes implied by the module: input_size = context_dim + sport_dim + user_dim + raw_dim
    B, T, H = 2, 8, 32
    D_USER, D_SPORT, D_CTX, D_RAW = 4, 4, 4, 4
    N = D_USER + D_SPORT + D_CTX + D_RAW            # input_size = 16
    NUM_USERS, NUM_SPORTS = 5, 3

    key = jax.random.PRNGKey(0)
    keys = jax.random.split(key, 12)

    # Deterministic "parameters" (synthetic; shapes match the nn.Module __init__)
    user_emb_table = 0.1 * jax.random.normal(keys[0], (NUM_USERS, D_USER), jnp.float32)
    sport_emb_table = 0.1 * jax.random.normal(keys[1], (NUM_SPORTS, D_SPORT), jnp.float32)
    w_ih = 0.1 * jax.random.normal(keys[2], (4 * H, N), jnp.float32)     # lstm weight_ih_l0
    w_hh = 0.1 * jax.random.normal(keys[3], (4 * H, H), jnp.float32)     # lstm weight_hh_l0
    b_ih = 0.1 * jax.random.normal(keys[4], (4 * H,), jnp.float32)
    b_hh = 0.1 * jax.random.normal(keys[5], (4 * H,), jnp.float32)
    b_comb = b_ih + b_hh
    wa = 0.1 * jax.random.normal(keys[6], (2 * H + T,), jnp.float32)     # attn_linear weight
    ba = 0.1 * jax.random.normal(keys[7], (), jnp.float32)               # attn_linear bias

    # Forward-input glue (embedding lookup + concatenation, as in the PyTorch forward)
    user_input = jax.random.randint(keys[8], (B, T), 0, NUM_USERS)       # attr_inputs['user_input']
    sport_input = jax.random.randint(keys[9], (B, T), 0, NUM_SPORTS)     # attr_inputs['sport_input']
    context_embedding = 0.5 * jax.random.normal(keys[10], (B, T, D_CTX), jnp.float32)
    input_variable = 0.5 * jax.random.normal(keys[11], (B, T, D_RAW), jnp.float32)

    user_embed = jnp.take(user_emb_table, user_input, axis=0)            # (B, T, D_USER)
    sport_embed = jnp.take(sport_emb_table, sport_input, axis=0)         # (B, T, D_SPORT)
    # Matches the PyTorch loop order: [context | sport | user | input_variable]
    iv = jnp.concatenate([user_embed, input_variable], axis=-1)
    iv = jnp.concatenate([sport_embed, iv], axis=-1)
    input_data = jnp.concatenate([context_embedding, iv], axis=-1)       # (B, T, N)

    # NOTE: nn.Dropout is constructed in __init__ but never applied in forward -> no-op here.

    run = jax.jit(encoder_pallas)
    input_weighted, input_encoded = run(input_data, w_ih, w_hh, b_comb, wa, ba)
    jax.block_until_ready((input_weighted, input_encoded))

    ref_w, ref_e = encoder_ref(input_data, w_ih, w_hh, b_comb, wa, ba)
    assert input_weighted.shape == (B, T, N)
    assert input_encoded.shape == (B, T, H)
    np.testing.assert_allclose(np.asarray(input_weighted), np.asarray(ref_w), atol=1e-5, rtol=1e-5)
    np.testing.assert_allclose(np.asarray(input_encoded), np.asarray(ref_e), atol=1e-5, rtol=1e-5)

    print("KERNEL_OK")
</pallas_src>

<mosaic_0001>
module attributes {stable_mosaic.version = 11 : i64} {
  func.func @encoder_kernel(%arg0: i32, %arg1: memref<8x128xf32, #tpu.memory_space<vmem>>, %arg2: memref<16x128xf32, #tpu.memory_space<vmem>>, %arg3: memref<32x128xf32, #tpu.memory_space<vmem>>, %arg4: memref<1x128xf32, #tpu.memory_space<vmem>>, %arg5: memref<1x64xf32, #tpu.memory_space<vmem>>, %arg6: memref<9xf32, #tpu.memory_space<smem>>, %arg7: memref<8x128xf32, #tpu.memory_space<vmem>>, %arg8: memref<8x256xf32, #tpu.memory_space<vmem>>) attributes {dimension_semantics = [#tpu.dimension_semantics<parallel>], iteration_bounds = array<i64: 1>, scalar_prefetch = 0 : i64, scratch_operands = 0 : i64, tpu.core_type = #tpu.core_type<tc>, window_params = [{transform_indices = @transform_0, window_bounds = array<i64: 8, 128>}, {pipeline_mode = #tpu.pipeline_mode<synchronous>, transform_indices = @transform_1, window_bounds = array<i64: 16, 128>}, {pipeline_mode = #tpu.pipeline_mode<synchronous>, transform_indices = @transform_2, window_bounds = array<i64: 32, 128>}, {pipeline_mode = #tpu.pipeline_mode<synchronous>, transform_indices = @transform_3, window_bounds = array<i64: 1, 128>}, {pipeline_mode = #tpu.pipeline_mode<synchronous>, transform_indices = @transform_4, window_bounds = array<i64: 1, 64>}, {transform_indices = @transform_5, window_bounds = array<i64: 9>}, {transform_indices = @transform_6, window_bounds = array<i64: 8, 128>}, {transform_indices = @transform_7, window_bounds = array<i64: 8, 256>}]} {
    %c0 = arith.constant 0 : index
    %c0_0 = arith.constant 0 : index
    %0 = vector.load %arg2[%c0, %c0_0] : memref<16x128xf32, #tpu.memory_space<vmem>>, vector<16x128xf32>
    %c0_1 = arith.constant 0 : index
    %c0_2 = arith.constant 0 : index
    %1 = vector.load %arg3[%c0_1, %c0_2] : memref<32x128xf32, #tpu.memory_space<vmem>>, vector<32x128xf32>
    %c0_3 = arith.constant 0 : index
    %c0_4 = arith.constant 0 : index
    %2 = vector.load %arg4[%c0_3, %c0_4] : memref<1x128xf32, #tpu.memory_space<vmem>>, vector<1x128xf32>
    %c0_5 = arith.constant 0 : index
    %c0_6 = arith.constant 0 : index
    %3 = vector.load %arg5[%c0_5, %c0_6] : memref<1x64xf32, #tpu.memory_space<vmem>>, vector<1x32xf32>
    %c0_7 = arith.constant 0 : index
    %c32 = arith.constant 32 : index
    %4 = vector.load %arg5[%c0_7, %c32] : memref<1x64xf32, #tpu.memory_space<vmem>>, vector<1x32xf32>
    %c0_8 = arith.constant 0 : index
    %c0_9 = arith.constant 0 : index
    %5 = vector.load %arg1[%c0_8, %c0_9] : memref<8x128xf32, #tpu.memory_space<vmem>>, vector<8x16xf32>
    %c0_10 = arith.constant 0 : index
    %6 = memref.load %arg6[%c0_10] : memref<9xf32, #tpu.memory_space<smem>>
    %7 = vector.broadcast %6 : f32 to vector<8x16xf32>
    %8 = arith.mulf %5, %7 : vector<8x16xf32>
    %c8 = arith.constant 8 : index
    %9 = memref.load %arg6[%c8] : memref<9xf32, #tpu.memory_space<smem>>
    %10 = vector.broadcast %9 : f32 to vector<8x16xf32>
    %11 = arith.addf %8, %10 : vector<8x16xf32>
    %c0_11 = arith.constant 0 : index
    %c16 = arith.constant 16 : index
    %12 = vector.load %arg1[%c0_11, %c16] : memref<8x128xf32, #tpu.memory_space<vmem>>, vector<8x16xf32>
    %c1 = arith.constant 1 : index
    %13 = memref.load %arg6[%c1] : memref<9xf32, #tpu.memory_space<smem>>
    %14 = vector.broadcast %13 : f32 to vector<8x16xf32>
    %15 = arith.mulf %12, %14 : vector<8x16xf32>
    %16 = arith.addf %11, %15 : vector<8x16xf32>
    %c0_12 = arith.constant 0 : index
    %c32_13 = arith.constant 32 : index
    %17 = vector.load %arg1[%c0_12, %c32_13] : memref<8x128xf32, #tpu.memory_space<vmem>>, vector<8x16xf32>
    %c2 = arith.constant 2 : index
    %18 = memref.load %arg6[%c2] : memref<9xf32, #tpu.memory_space<smem>>
    %19 = vector.broadcast %18 : f32 to vector<8x16xf32>
    %20 = arith.mulf %17, %19 : vector<8x16xf32>
    %21 = arith.addf %16, %20 : vector<8x16xf32>
    %c0_14 = arith.constant 0 : index
    %c48 = arith.constant 48 : index
    %22 = vector.load %arg1[%c0_14, %c48] : memref<8x128xf32, #tpu.memory_space<vmem>>, vector<8x16xf32>
    %c3 = arith.constant 3 : index
    %23 = memref.load %arg6[%c3] : memref<9xf32, #tpu.memory_space<smem>>
    %24 = vector.broadcast %23 : f32 to vector<8x16xf32>
    %25 = arith.mulf %22, %24 : vector<8x16xf32>
    %26 = arith.addf %21, %25 : vector<8x16xf32>
    %c0_15 = arith.constant 0 : index
    %c64 = arith.constant 64 : index
    %27 = vector.load %arg1[%c0_15, %c64] : memref<8x128xf32, #tpu.memory_space<vmem>>, vector<8x16xf32>
    %c4 = arith.constant 4 : index
    %28 = memref.load %arg6[%c4] : memref<9xf32, #tpu.memory_space<smem>>
    %29 = vector.broadcast %28 : f32 to vector<8x16xf32>
    %30 = arith.mulf %27, %29 : vector<8x16xf32>
    %31 = arith.addf %26, %30 : vector<8x16xf32>
    %c0_16 = arith.constant 0 : index
    %c80 = arith.constant 80 : index
    %32 = vector.load %arg1[%c0_16, %c80] : memref<8x128xf32, #tpu.memory_space<vmem>>, vector<8x16xf32>
    %c5 = arith.constant 5 : index
    %33 = memref.load %arg6[%c5] : memref<9xf32, #tpu.memory_space<smem>>
    %34 = vector.broadcast %33 : f32 to vector<8x16xf32>
    %35 = arith.mulf %32, %34 : vector<8x16xf32>
    %36 = arith.addf %31, %35 : vector<8x16xf32>
    %c0_17 = arith.constant 0 : index
    %c96 = arith.constant 96 : index
    %37 = vector.load %arg1[%c0_17, %c96] : memref<8x128xf32, #tpu.memory_space<vmem>>, vector<8x16xf32>
    %c6 = arith.constant 6 : index
    %38 = memref.load %arg6[%c6] : memref<9xf32, #tpu.memory_space<smem>>
    %39 = vector.broadcast %38 : f32 to vector<8x16xf32>
    %40 = arith.mulf %37, %39 : vector<8x16xf32>
    %41 = arith.addf %36, %40 : vector<8x16xf32>
    %c0_18 = arith.constant 0 : index
    %c112 = arith.constant 112 : index
    %42 = vector.load %arg1[%c0_18, %c112] : memref<8x128xf32, #tpu.memory_space<vmem>>, vector<8x16xf32>
    %c7 = arith.constant 7 : index
    %43 = memref.load %arg6[%c7] : memref<9xf32, #tpu.memory_space<smem>>
    %44 = vector.broadcast %43 : f32 to vector<8x16xf32>
    %45 = arith.mulf %42, %44 : vector<8x16xf32>
    %46 = arith.addf %41, %45 : vector<8x16xf32>
    %cst = arith.constant 0.000000e+00 : f32
    %47 = vector.broadcast %cst : f32 to vector<8x32xf32>
    %cst_19 = arith.constant 0.000000e+00 : f32
    %48 = vector.broadcast %cst_19 : f32 to vector<8x32xf32>
    %49 = vector.broadcast %3 : vector<1x32xf32> to vector<8x32xf32>
    %50 = arith.mulf %47, %49 : vector<8x32xf32>
    %51 = vector.broadcast %4 : vector<1x32xf32> to vector<8x32xf32>
    %52 = arith.mulf %48, %51 : vector<8x32xf32>
    %53 = arith.addf %50, %52 : vector<8x32xf32>
    %cst_20 = arith.constant dense<0.000000e+00> : vector<8xf32>
    %54 = vector.multi_reduction <add>, %53, %cst_20 [1] : vector<8x32xf32> to vector<8xf32>
    %55 = vector.shape_cast %54 : vector<8xf32> to vector<8x1xf32>
    %56 = vector.broadcast %55 : vector<8x1xf32> to vector<8x16xf32>
    %57 = arith.addf %46, %56 : vector<8x16xf32>
    %cst_21 = arith.constant dense<0xFF800000> : vector<8xf32>
    %58 = vector.multi_reduction <maximumf>, %57, %cst_21 [1] : vector<8x16xf32> to vector<8xf32>
    %59 = vector.shape_cast %58 : vector<8xf32> to vector<8x1xf32>
    %60 = vector.broadcast %59 : vector<8x1xf32> to vector<8x16xf32>
    %61 = arith.subf %57, %60 : vector<8x16xf32>
    %62 = math.exp %61 : vector<8x16xf32>
    %cst_22 = arith.constant dense<0.000000e+00> : vector<8xf32>
    %63 = vector.multi_reduction <add>, %62, %cst_22 [1] : vector<8x16xf32> to vector<8xf32>
    %64 = vector.shape_cast %63 : vector<8xf32> to vector<8x1xf32>
    %c0_23 = arith.constant 0 : index
    %c0_24 = arith.constant 0 : index
    %65 = vector.load %arg1[%c0_23, %c0_24] : memref<8x128xf32, #tpu.memory_space<vmem>>, vector<8x16xf32>
    %66 = arith.mulf %62, %65 : vector<8x16xf32>
    %cst_25 = arith.constant dense<0.000000e+00> : vector<8x128xf32>
    %67 = tpu.matmul %66, %0, %cst_25 {dimension_numbers = #tpu.dot_dimension_numbers<[1], [0], [0], [1], [0, 0, 1, 1], [], []>} : vector<8x16xf32>, vector<16x128xf32>, vector<8x128xf32> -> vector<8x128xf32>
    %cst_26 = arith.constant dense<0.000000e+00> : vector<8x128xf32>
    %68 = tpu.matmul %47, %1, %cst_26 {dimension_numbers = #tpu.dot_dimension_numbers<[1], [0], [0], [1], [0, 0, 1, 1], [], []>} : vector<8x32xf32>, vector<32x128xf32>, vector<8x128xf32> -> vector<8x128xf32>
    %69 = tpu.reciprocal %64 : vector<8x1xf32> -> vector<8x1xf32>
    %70 = vector.broadcast %69 : vector<8x1xf32> to vector<8x128xf32>
    %71 = arith.mulf %67, %70 : vector<8x128xf32>
    %72 = arith.addf %71, %68 : vector<8x128xf32>
    %73 = vector.broadcast %2 : vector<1x128xf32> to vector<8x128xf32>
    %74 = arith.addf %72, %73 : vector<8x128xf32>
    %75 = vector.extract_strided_slice %74 {offsets = [0, 0], sizes = [8, 32], strides = [1, 1]} : vector<8x128xf32> to vector<8x32xf32>
    %76 = arith.negf %75 : vector<8x32xf32>
    %77 = math.exp %76 : vector<8x32xf32>
    %cst_27 = arith.constant 1.000000e+00 : f32
    %78 = vector.broadcast %cst_27 : f32 to vector<8x32xf32>
    %79 = arith.addf %78, %77 : vector<8x32xf32>
    %80 = arith.divf %78, %79 : vector<8x32xf32>
    %81 = vector.extract_strided_slice %74 {offsets = [0, 32], sizes = [8, 32], strides = [1, 1]} : vector<8x128xf32> to vector<8x32xf32>
    %82 = arith.negf %81 : vector<8x32xf32>
    %83 = math.exp %82 : vector<8x32xf32>
    %cst_28 = arith.constant 1.000000e+00 : f32
    %84 = vector.broadcast %cst_28 : f32 to vector<8x32xf32>
    %85 = arith.addf %84, %83 : vector<8x32xf32>
    %86 = arith.divf %84, %85 : vector<8x32xf32>
    %87 = vector.extract_strided_slice %74 {offsets = [0, 64], sizes = [8, 32], strides = [1, 1]} : vector<8x128xf32> to vector<8x32xf32>
    %88 = math.tanh %87 : vector<8x32xf32>
    %89 = vector.extract_strided_slice %74 {offsets = [0, 96], sizes = [8, 32], strides = [1, 1]} : vector<8x128xf32> to vector<8x32xf32>
    %90 = arith.negf %89 : vector<8x32xf32>
    %91 = math.exp %90 : vector<8x32xf32>
    %cst_29 = arith.constant 1.000000e+00 : f32
    %92 = vector.broadcast %cst_29 : f32 to vector<8x32xf32>
    %93 = arith.addf %92, %91 : vector<8x32xf32>
    %94 = arith.divf %92, %93 : vector<8x32xf32>
    %95 = arith.mulf %86, %48 : vector<8x32xf32>
    %96 = arith.mulf %80, %88 : vector<8x32xf32>
    %97 = arith.addf %95, %96 : vector<8x32xf32>
    %98 = math.tanh %97 : vector<8x32xf32>
    %99 = arith.mulf %94, %98 : vector<8x32xf32>
    %100 = vector.broadcast %69 : vector<8x1xf32> to vector<8x16xf32>
    %101 = arith.mulf %66, %100 : vector<8x16xf32>
    %c0_30 = arith.constant 0 : index
    %c0_31 = arith.constant 0 : index
    %102 = vector.load %arg7[%c0_30, %c0_31] : memref<8x128xf32, #tpu.memory_space<vmem>>, vector<8x16xf32>
    tpu.vector_store %arg7[%c0_30, %c0_31], %101 {strides = array<i32>} : memref<8x128xf32, #tpu.memory_space<vmem>>, vector<8x16xf32>,
    %c0_32 = arith.constant 0 : index
    %c0_33 = arith.constant 0 : index
    %103 = vector.load %arg8[%c0_32, %c0_33] : memref<8x256xf32, #tpu.memory_space<vmem>>, vector<8x32xf32>
    tpu.vector_store %arg8[%c0_32, %c0_33], %99 {strides = array<i32>} : memref<8x256xf32, #tpu.memory_space<vmem>>, vector<8x32xf32>,
    %104 = vector.broadcast %3 : vector<1x32xf32> to vector<8x32xf32>
    %105 = arith.mulf %99, %104 : vector<8x32xf32>
    %106 = vector.broadcast %4 : vector<1x32xf32> to vector<8x32xf32>
    %107 = arith.mulf %97, %106 : vector<8x32xf32>
    %108 = arith.addf %105, %107 : vector<8x32xf32>
    %cst_34 = arith.constant dense<0.000000e+00> : vector<8xf32>
    %109 = vector.multi_reduction <add>, %108, %cst_34 [1] : vector<8x32xf32> to vector<8xf32>
    %110 = vector.shape_cast %109 : vector<8xf32> to vector<8x1xf32>
    %111 = vector.broadcast %110 : vector<8x1xf32> to vector<8x16xf32>
    %112 = arith.addf %46, %111 : vector<8x16xf32>
    %cst_35 = arith.constant dense<0xFF800000> : vector<8xf32>
    %113 = vector.multi_reduction <maximumf>, %112, %cst_35 [1] : vector<8x16xf32> to vector<8xf32>
    %114 = vector.shape_cast %113 : vector<8xf32> to vector<8x1xf32>
    %115 = vector.broadcast %114 : vector<8x1xf32> to vector<8x16xf32>
    %116 = arith.subf %112, %115 : vector<8x16xf32>
    %117 = math.exp %116 : vector<8x16xf32>
    %cst_36 = arith.constant dense<0.000000e+00> : vector<8xf32>
    %118 = vector.multi_reduction <add>, %117, %cst_36 [1] : vector<8x16xf32> to vector<8xf32>
    %119 = vector.shape_cast %118 : vector<8xf32> to vector<8x1xf32>
    %c0_37 = arith.constant 0 : index
    %c16_38 = arith.constant 16 : index
    %120 = vector.load %arg1[%c0_37, %c16_38] : memref<8x128xf32, #tpu.memory_space<vmem>>, vector<8x16xf32>
    %121 = arith.mulf %117, %120 : vector<8x16xf32>
    %cst_39 = arith.constant dense<0.000000e+00> : vector<8x128xf32>
    %122 = tpu.matmul %121, %0, %cst_39 {dimension_numbers = #tpu.dot_dimension_numbers<[1], [0], [0], [1], [0, 0, 1, 1], [], []>} : vector<8x16xf32>, vector<16x128xf32>, vector<8x128xf32> -> vector<8x128xf32>
    %cst_40 = arith.constant dense<0.000000e+00> : vector<8x128xf32>
    %123 = tpu.matmul %99, %1, %cst_40 {dimension_numbers = #tpu.dot_dimension_numbers<[1], [0], [0], [1], [0, 0, 1, 1], [], []>} : vector<8x32xf32>, vector<32x128xf32>, vector<8x128xf32> -> vector<8x128xf32>
    %124 = tpu.reciprocal %119 : vector<8x1xf32> -> vector<8x1xf32>
    %125 = vector.broadcast %124 : vector<8x1xf32> to vector<8x128xf32>
    %126 = arith.mulf %122, %125 : vector<8x128xf32>
    %127 = arith.addf %126, %123 : vector<8x128xf32>
    %128 = vector.broadcast %2 : vector<1x128xf32> to vector<8x128xf32>
    %129 = arith.addf %127, %128 : vector<8x128xf32>
    %130 = vector.extract_strided_slice %129 {offsets = [0, 0], sizes = [8, 32], strides = [1, 1]} : vector<8x128xf32> to vector<8x32xf32>
    %131 = arith.negf %130 : vector<8x32xf32>
    %132 = math.exp %131 : vector<8x32xf32>
    %cst_41 = arith.constant 1.000000e+00 : f32
    %133 = vector.broadcast %cst_41 : f32 to vector<8x32xf32>
    %134 = arith.addf %133, %132 : vector<8x32xf32>
    %135 = arith.divf %133, %134 : vector<8x32xf32>
    %136 = vector.extract_strided_slice %129 {offsets = [0, 32], sizes = [8, 32], strides = [1, 1]} : vector<8x128xf32> to vector<8x32xf32>
    %137 = arith.negf %136 : vector<8x32xf32>
    %138 = math.exp %137 : vector<8x32xf32>
    %cst_42 = arith.constant 1.000000e+00 : f32
    %139 = vector.broadcast %cst_42 : f32 to vector<8x32xf32>
    %140 = arith.addf %139, %138 : vector<8x32xf32>
    %141 = arith.divf %139, %140 : vector<8x32xf32>
    %142 = vector.extract_strided_slice %129 {offsets = [0, 64], sizes = [8, 32], strides = [1, 1]} : vector<8x128xf32> to vector<8x32xf32>
    %143 = math.tanh %142 : vector<8x32xf32>
    %144 = vector.extract_strided_slice %129 {offsets = [0, 96], sizes = [8, 32], strides = [1, 1]} : vector<8x128xf32> to vector<8x32xf32>
    %145 = arith.negf %144 : vector<8x32xf32>
    %146 = math.exp %145 : vector<8x32xf32>
    %cst_43 = arith.constant 1.000000e+00 : f32
    %147 = vector.broadcast %cst_43 : f32 to vector<8x32xf32>
    %148 = arith.addf %147, %146 : vector<8x32xf32>
    %149 = arith.divf %147, %148 : vector<8x32xf32>
    %150 = arith.mulf %141, %97 : vector<8x32xf32>
    %151 = arith.mulf %135, %143 : vector<8x32xf32>
    %152 = arith.addf %150, %151 : vector<8x32xf32>
    %153 = math.tanh %152 : vector<8x32xf32>
    %154 = arith.mulf %149, %153 : vector<8x32xf32>
    %155 = vector.broadcast %124 : vector<8x1xf32> to vector<8x16xf32>
    %156 = arith.mulf %121, %155 : vector<8x16xf32>
    %c0_44 = arith.constant 0 : index
    %c16_45 = arith.constant 16 : index
    %157 = vector.load %arg7[%c0_44, %c16_45] : memref<8x128xf32, #tpu.memory_space<vmem>>, vector<8x16xf32>
    tpu.vector_store %arg7[%c0_44, %c16_45], %156 {strides = array<i32>} : memref<8x128xf32, #tpu.memory_space<vmem>>, vector<8x16xf32>,
    %c0_46 = arith.constant 0 : index
    %c32_47 = arith.constant 32 : index
    %158 = vector.load %arg8[%c0_46, %c32_47] : memref<8x256xf32, #tpu.memory_space<vmem>>, vector<8x32xf32>
    tpu.vector_store %arg8[%c0_46, %c32_47], %154 {strides = array<i32>} : memref<8x256xf32, #tpu.memory_space<vmem>>, vector<8x32xf32>,
    %159 = vector.broadcast %3 : vector<1x32xf32> to vector<8x32xf32>
    %160 = arith.mulf %154, %159 : vector<8x32xf32>
    %161 = vector.broadcast %4 : vector<1x32xf32> to vector<8x32xf32>
    %162 = arith.mulf %152, %161 : vector<8x32xf32>
    %163 = arith.addf %160, %162 : vector<8x32xf32>
    %cst_48 = arith.constant dense<0.000000e+00> : vector<8xf32>
    %164 = vector.multi_reduction <add>, %163, %cst_48 [1] : vector<8x32xf32> to vector<8xf32>
    %165 = vector.shape_cast %164 : vector<8xf32> to vector<8x1xf32>
    %166 = vector.broadcast %165 : vector<8x1xf32> to vector<8x16xf32>
    %167 = arith.addf %46, %166 : vector<8x16xf32>
    %cst_49 = arith.constant dense<0xFF800000> : vector<8xf32>
    %168 = vector.multi_reduction <maximumf>, %167, %cst_49 [1] : vector<8x16xf32> to vector<8xf32>
    %169 = vector.shape_cast %168 : vector<8xf32> to vector<8x1xf32>
    %170 = vector.broadcast %169 : vector<8x1xf32> to vector<8x16xf32>
    %171 = arith.subf %167, %170 : vector<8x16xf32>
    %172 = math.exp %171 : vector<8x16xf32>
    %cst_50 = arith.constant dense<0.000000e+00> : vector<8xf32>
    %173 = vector.multi_reduction <add>, %172, %cst_50 [1] : vector<8x16xf32> to vector<8xf32>
    %174 = vector.shape_cast %173 : vector<8xf32> to vector<8x1xf32>
    %c0_51 = arith.constant 0 : index
    %c32_52 = arith.constant 32 : index
    %175 = vector.load %arg1[%c0_51, %c32_52] : memref<8x128xf32, #tpu.memory_space<vmem>>, vector<8x16xf32>
    %176 = arith.mulf %172, %175 : vector<8x16xf32>
    %cst_53 = arith.constant dense<0.000000e+00> : vector<8x128xf32>
    %177 = tpu.matmul %176, %0, %cst_53 {dimension_numbers = #tpu.dot_dimension_numbers<[1], [0], [0], [1], [0, 0, 1, 1], [], []>} : vector<8x16xf32>, vector<16x128xf32>, vector<8x128xf32> -> vector<8x128xf32>
    %cst_54 = arith.constant dense<0.000000e+00> : vector<8x128xf32>
    %178 = tpu.matmul %154, %1, %cst_54 {dimension_numbers = #tpu.dot_dimension_numbers<[1], [0], [0], [1], [0, 0, 1, 1], [], []>} : vector<8x32xf32>, vector<32x128xf32>, vector<8x128xf32> -> vector<8x128xf32>
    %179 = tpu.reciprocal %174 : vector<8x1xf32> -> vector<8x1xf32>
    %180 = vector.broadcast %179 : vector<8x1xf32> to vector<8x128xf32>
    %181 = arith.mulf %177, %180 : vector<8x128xf32>
    %182 = arith.addf %181, %178 : vector<8x128xf32>
    %183 = vector.broadcast %2 : vector<1x128xf32> to vector<8x128xf32>
    %184 = arith.addf %182, %183 : vector<8x128xf32>
    %185 = vector.extract_strided_slice %184 {offsets = [0, 0], sizes = [8, 32], strides = [1, 1]} : vector<8x128xf32> to vector<8x32xf32>
    %186 = arith.negf %185 : vector<8x32xf32>
    %187 = math.exp %186 : vector<8x32xf32>
    %cst_55 = arith.constant 1.000000e+00 : f32
    %188 = vector.broadcast %cst_55 : f32 to vector<8x32xf32>
    %189 = arith.addf %188, %187 : vector<8x32xf32>
    %190 = arith.divf %188, %189 : vector<8x32xf32>
    %191 = vector.extract_strided_slice %184 {offsets = [0, 32], sizes = [8, 32], strides = [1, 1]} : vector<8x128xf32> to vector<8x32xf32>
    %192 = arith.negf %191 : vector<8x32xf32>
    %193 = math.exp %192 : vector<8x32xf32>
    %cst_56 = arith.constant 1.000000e+00 : f32
    %194 = vector.broadcast %cst_56 : f32 to vector<8x32xf32>
    %195 = arith.addf %194, %193 : vector<8x32xf32>
    %196 = arith.divf %194, %195 : vector<8x32xf32>
    %197 = vector.extract_strided_slice %184 {offsets = [0, 64], sizes = [8, 32], strides = [1, 1]} : vector<8x128xf32> to vector<8x32xf32>
    %198 = math.tanh %197 : vector<8x32xf32>
    %199 = vector.extract_strided_slice %184 {offsets = [0, 96], sizes = [8, 32], strides = [1, 1]} : vector<8x128xf32> to vector<8x32xf32>
    %200 = arith.negf %199 : vector<8x32xf32>
    %201 = math.exp %200 : vector<8x32xf32>
    %cst_57 = arith.constant 1.000000e+00 : f32
    %202 = vector.broadcast %cst_57 : f32 to vector<8x32xf32>
    %203 = arith.addf %202, %201 : vector<8x32xf32>
    %204 = arith.divf %202, %203 : vector<8x32xf32>
    %205 = arith.mulf %196, %152 : vector<8x32xf32>
    %206 = arith.mulf %190, %198 : vector<8x32xf32>
    %207 = arith.addf %205, %206 : vector<8x32xf32>
    %208 = math.tanh %207 : vector<8x32xf32>
    %209 = arith.mulf %204, %208 : vector<8x32xf32>
    %210 = vector.broadcast %179 : vector<8x1xf32> to vector<8x16xf32>
    %211 = arith.mulf %176, %210 : vector<8x16xf32>
    %c0_58 = arith.constant 0 : index
    %c32_59 = arith.constant 32 : index
    %212 = vector.load %arg7[%c0_58, %c32_59] : memref<8x128xf32, #tpu.memory_space<vmem>>, vector<8x16xf32>
    tpu.vector_store %arg7[%c0_58, %c32_59], %211 {strides = array<i32>} : memref<8x128xf32, #tpu.memory_space<vmem>>, vector<8x16xf32>,
    %c0_60 = arith.constant 0 : index
    %c64_61 = arith.constant 64 : index
    %213 = vector.load %arg8[%c0_60, %c64_61] : memref<8x256xf32, #tpu.memory_space<vmem>>, vector<8x32xf32>
    tpu.vector_store %arg8[%c0_60, %c64_61], %209 {strides = array<i32>} : memref<8x256xf32, #tpu.memory_space<vmem>>, vector<8x32xf32>,
    %214 = vector.broadcast %3 : vector<1x32xf32> to vector<8x32xf32>
    %215 = arith.mulf %209, %214 : vector<8x32xf32>
    %216 = vector.broadcast %4 : vector<1x32xf32> to vector<8x32xf32>
    %217 = arith.mulf %207, %216 : vector<8x32xf32>
    %218 = arith.addf %215, %217 : vector<8x32xf32>
    %cst_62 = arith.constant dense<0.000000e+00> : vector<8xf32>
    %219 = vector.multi_reduction <add>, %218, %cst_62 [1] : vector<8x32xf32> to vector<8xf32>
    %220 = vector.shape_cast %219 : vector<8xf32> to vector<8x1xf32>
    %221 = vector.broadcast %220 : vector<8x1xf32> to vector<8x16xf32>
    %222 = arith.addf %46, %221 : vector<8x16xf32>
    %cst_63 = arith.constant dense<0xFF800000> : vector<8xf32>
    %223 = vector.multi_reduction <maximumf>, %222, %cst_63 [1] : vector<8x16xf32> to vector<8xf32>
    %224 = vector.shape_cast %223 : vector<8xf32> to vector<8x1xf32>
    %225 = vector.broadcast %224 : vector<8x1xf32> to vector<8x16xf32>
    %226 = arith.subf %222, %225 : vector<8x16xf32>
    %227 = math.exp %226 : vector<8x16xf32>
    %cst_64 = arith.constant dense<0.000000e+00> : vector<8xf32>
    %228 = vector.multi_reduction <add>, %227, %cst_64 [1] : vector<8x16xf32> to vector<8xf32>
    %229 = vector.shape_cast %228 : vector<8xf32> to vector<8x1xf32>
    %c0_65 = arith.constant 0 : index
    %c48_66 = arith.constant 48 : index
    %230 = vector.load %arg1[%c0_65, %c48_66] : memref<8x128xf32, #tpu.memory_space<vmem>>, vector<8x16xf32>
    %231 = arith.mulf %227, %230 : vector<8x16xf32>
    %cst_67 = arith.constant dense<0.000000e+00> : vector<8x128xf32>
    %232 = tpu.matmul %231, %0, %cst_67 {dimension_numbers = #tpu.dot_dimension_numbers<[1], [0], [0], [1], [0, 0, 1, 1], [], []>} : vector<8x16xf32>, vector<16x128xf32>, vector<8x128xf32> -> vector<8x128xf32>
    %cst_68 = arith.constant dense<0.000000e+00> : vector<8x128xf32>
    %233 = tpu.matmul %209, %1, %cst_68 {dimension_numbers = #tpu.dot_dimension_numbers<[1], [0], [0], [1], [0, 0, 1, 1], [], []>} : vector<8x32xf32>, vector<32x128xf32>, vector<8x128xf32> -> vector<8x128xf32>
    %234 = tpu.reciprocal %229 : vector<8x1xf32> -> vector<8x1xf32>
    %235 = vector.broadcast %234 : vector<8x1xf32> to vector<8x128xf32>
    %236 = arith.mulf %232, %235 : vector<8x128xf32>
    %237 = arith.addf %236, %233 : vector<8x128xf32>
    %238 = vector.broadcast %2 : vector<1x128xf32> to vector<8x128xf32>
    %239 = arith.addf %237, %238 : vector<8x128xf32>
    %240 = vector.extract_strided_slice %239 {offsets = [0, 0], sizes = [8, 32], strides = [1, 1]} : vector<8x128xf32> to vector<8x32xf32>
    %241 = arith.negf %240 : vector<8x32xf32>
    %242 = math.exp %241 : vector<8x32xf32>
    %cst_69 = arith.constant 1.000000e+00 : f32
    %243 = vector.broadcast %cst_69 : f32 to vector<8x32xf32>
    %244 = arith.addf %243, %242 : vector<8x32xf32>
    %245 = arith.divf %243, %244 : vector<8x32xf32>
    %246 = vector.extract_strided_slice %239 {offsets = [0, 32], sizes = [8, 32], strides = [1, 1]} : vector<8x128xf32> to vector<8x32xf32>
    %247 = arith.negf %246 : vector<8x32xf32>
    %248 = math.exp %247 : vector<8x32xf32>
    %cst_70 = arith.constant 1.000000e+00 : f32
    %249 = vector.broadcast %cst_70 : f32 to vector<8x32xf32>
    %250 = arith.addf %249, %248 : vector<8x32xf32>
    %251 = arith.divf %249, %250 : vector<8x32xf32>
    %252 = vector.extract_strided_slice %239 {offsets = [0, 64], sizes = [8, 32], strides = [1, 1]} : vector<8x128xf32> to vector<8x32xf32>
    %253 = math.tanh %252 : vector<8x32xf32>
    %254 = vector.extract_strided_slice %239 {offsets = [0, 96], sizes = [8, 32], strides = [1, 1]} : vector<8x128xf32> to vector<8x32xf32>
    %255 = arith.negf %254 : vector<8x32xf32>
    %256 = math.exp %255 : vector<8x32xf32>
    %cst_71 = arith.constant 1.000000e+00 : f32
    %257 = vector.broadcast %cst_71 : f32 to vector<8x32xf32>
    %258 = arith.addf %257, %256 : vector<8x32xf32>
    %259 = arith.divf %257, %258 : vector<8x32xf32>
    %260 = arith.mulf %251, %207 : vector<8x32xf32>
    %261 = arith.mulf %245, %253 : vector<8x32xf32>
    %262 = arith.addf %260, %261 : vector<8x32xf32>
    %263 = math.tanh %262 : vector<8x32xf32>
    %264 = arith.mulf %259, %263 : vector<8x32xf32>
    %265 = vector.broadcast %234 : vector<8x1xf32> to vector<8x16xf32>
    %266 = arith.mulf %231, %265 : vector<8x16xf32>
    %c0_72 = arith.constant 0 : index
    %c48_73 = arith.constant 48 : index
    %267 = vector.load %arg7[%c0_72, %c48_73] : memref<8x128xf32, #tpu.memory_space<vmem>>, vector<8x16xf32>
    tpu.vector_store %arg7[%c0_72, %c48_73], %266 {strides = array<i32>} : memref<8x128xf32, #tpu.memory_space<vmem>>, vector<8x16xf32>,
    %c0_74 = arith.constant 0 : index
    %c96_75 = arith.constant 96 : index
    %268 = vector.load %arg8[%c0_74, %c96_75] : memref<8x256xf32, #tpu.memory_space<vmem>>, vector<8x32xf32>
    tpu.vector_store %arg8[%c0_74, %c96_75], %264 {strides = array<i32>} : memref<8x256xf32, #tpu.memory_space<vmem>>, vector<8x32xf32>,
    %269 = vector.broadcast %3 : vector<1x32xf32> to vector<8x32xf32>
    %270 = arith.mulf %264, %269 : vector<8x32xf32>
    %271 = vector.broadcast %4 : vector<1x32xf32> to vector<8x32xf32>
    %272 = arith.mulf %262, %271 : vector<8x32xf32>
    %273 = arith.addf %270, %272 : vector<8x32xf32>
    %cst_76 = arith.constant dense<0.000000e+00> : vector<8xf32>
    %274 = vector.multi_reduction <add>, %273, %cst_76 [1] : vector<8x32xf32> to vector<8xf32>
    %275 = vector.shape_cast %274 : vector<8xf32> to vector<8x1xf32>
    %276 = vector.broadcast %275 : vector<8x1xf32> to vector<8x16xf32>
    %277 = arith.addf %46, %276 : vector<8x16xf32>
    %cst_77 = arith.constant dense<0xFF800000> : vector<8xf32>
    %278 = vector.multi_reduction <maximumf>, %277, %cst_77 [1] : vector<8x16xf32> to vector<8xf32>
    %279 = vector.shape_cast %278 : vector<8xf32> to vector<8x1xf32>
    %280 = vector.broadcast %279 : vector<8x1xf32> to vector<8x16xf32>
    %281 = arith.subf %277, %280 : vector<8x16xf32>
    %282 = math.exp %281 : vector<8x16xf32>
    %cst_78 = arith.constant dense<0.000000e+00> : vector<8xf32>
    %283 = vector.multi_reduction <add>, %282, %cst_78 [1] : vector<8x16xf32> to vector<8xf32>
    %284 = vector.shape_cast %283 : vector<8xf32> to vector<8x1xf32>
    %c0_79 = arith.constant 0 : index
    %c64_80 = arith.constant 64 : index
    %285 = vector.load %arg1[%c0_79, %c64_80] : memref<8x128xf32, #tpu.memory_space<vmem>>, vector<8x16xf32>
    %286 = arith.mulf %282, %285 : vector<8x16xf32>
    %cst_81 = arith.constant dense<0.000000e+00> : vector<8x128xf32>
    %287 = tpu.matmul %286, %0, %cst_81 {dimension_numbers = #tpu.dot_dimension_numbers<[1], [0], [0], [1], [0, 0, 1, 1], [], []>} : vector<8x16xf32>, vector<16x128xf32>, vector<8x128xf32> -> vector<8x128xf32>
    %cst_82 = arith.constant dense<0.000000e+00> : vector<8x128xf32>
    %288 = tpu.matmul %264, %1, %cst_82 {dimension_numbers = #tpu.dot_dimension_numbers<[1], [0], [0], [1], [0, 0, 1, 1], [], []>} : vector<8x32xf32>, vector<32x128xf32>, vector<8x128xf32> -> vector<8x128xf32>
    %289 = tpu.reciprocal %284 : vector<8x1xf32> -> vector<8x1xf32>
    %290 = vector.broadcast %289 : vector<8x1xf32> to vector<8x128xf32>
    %291 = arith.mulf %287, %290 : vector<8x128xf32>
    %292 = arith.addf %291, %288 : vector<8x128xf32>
    %293 = vector.broadcast %2 : vector<1x128xf32> to vector<8x128xf32>
    %294 = arith.addf %292, %293 : vector<8x128xf32>
    %295 = vector.extract_strided_slice %294 {offsets = [0, 0], sizes = [8, 32], strides = [1, 1]} : vector<8x128xf32> to vector<8x32xf32>
    %296 = arith.negf %295 : vector<8x32xf32>
    %297 = math.exp %296 : vector<8x32xf32>
    %cst_83 = arith.constant 1.000000e+00 : f32
    %298 = vector.broadcast %cst_83 : f32 to vector<8x32xf32>
    %299 = arith.addf %298, %297 : vector<8x32xf32>
    %300 = arith.divf %298, %299 : vector<8x32xf32>
    %301 = vector.extract_strided_slice %294 {offsets = [0, 32], sizes = [8, 32], strides = [1, 1]} : vector<8x128xf32> to vector<8x32xf32>
    %302 = arith.negf %301 : vector<8x32xf32>
    %303 = math.exp %302 : vector<8x32xf32>
    %cst_84 = arith.constant 1.000000e+00 : f32
    %304 = vector.broadcast %cst_84 : f32 to vector<8x32xf32>
    %305 = arith.addf %304, %303 : vector<8x32xf32>
    %306 = arith.divf %304, %305 : vector<8x32xf32>
    %307 = vector.extract_strided_slice %294 {offsets = [0, 64], sizes = [8, 32], strides = [1, 1]} : vector<8x128xf32> to vector<8x32xf32>
    %308 = math.tanh %307 : vector<8x32xf32>
    %309 = vector.extract_strided_slice %294 {offsets = [0, 96], sizes = [8, 32], strides = [1, 1]} : vector<8x128xf32> to vector<8x32xf32>
    %310 = arith.negf %309 : vector<8x32xf32>
    %311 = math.exp %310 : vector<8x32xf32>
    %cst_85 = arith.constant 1.000000e+00 : f32
    %312 = vector.broadcast %cst_85 : f32 to vector<8x32xf32>
    %313 = arith.addf %312, %311 : vector<8x32xf32>
    %314 = arith.divf %312, %313 : vector<8x32xf32>
    %315 = arith.mulf %306, %262 : vector<8x32xf32>
    %316 = arith.mulf %300, %308 : vector<8x32xf32>
    %317 = arith.addf %315, %316 : vector<8x32xf32>
    %318 = math.tanh %317 : vector<8x32xf32>
    %319 = arith.mulf %314, %318 : vector<8x32xf32>
    %320 = vector.broadcast %289 : vector<8x1xf32> to vector<8x16xf32>
    %321 = arith.mulf %286, %320 : vector<8x16xf32>
    %c0_86 = arith.constant 0 : index
    %c64_87 = arith.constant 64 : index
    %322 = vector.load %arg7[%c0_86, %c64_87] : memref<8x128xf32, #tpu.memory_space<vmem>>, vector<8x16xf32>
    tpu.vector_store %arg7[%c0_86, %c64_87], %321 {strides = array<i32>} : memref<8x128xf32, #tpu.memory_space<vmem>>, vector<8x16xf32>,
    %c0_88 = arith.constant 0 : index
    %c128 = arith.constant 128 : index
    %323 = vector.load %arg8[%c0_88, %c128] : memref<8x256xf32, #tpu.memory_space<vmem>>, vector<8x32xf32>
    tpu.vector_store %arg8[%c0_88, %c128], %319 {strides = array<i32>} : memref<8x256xf32, #tpu.memory_space<vmem>>, vector<8x32xf32>,
    %324 = vector.broadcast %3 : vector<1x32xf32> to vector<8x32xf32>
    %325 = arith.mulf %319, %324 : vector<8x32xf32>
    %326 = vector.broadcast %4 : vector<1x32xf32> to vector<8x32xf32>
    %327 = arith.mulf %317, %326 : vector<8x32xf32>
    %328 = arith.addf %325, %327 : vector<8x32xf32>
    %cst_89 = arith.constant dense<0.000000e+00> : vector<8xf32>
    %329 = vector.multi_reduction <add>, %328, %cst_89 [1] : vector<8x32xf32> to vector<8xf32>
    %330 = vector.shape_cast %329 : vector<8xf32> to vector<8x1xf32>
    %331 = vector.broadcast %330 : vector<8x1xf32> to vector<8x16xf32>
    %332 = arith.addf %46, %331 : vector<8x16xf32>
    %cst_90 = arith.constant dense<0xFF800000> : vector<8xf32>
    %333 = vector.multi_reduction <maximumf>, %332, %cst_90 [1] : vector<8x16xf32> to vector<8xf32>
    %334 = vector.shape_cast %333 : vector<8xf32> to vector<8x1xf32>
    %335 = vector.broadcast %334 : vector<8x1xf32> to vector<8x16xf32>
    %336 = arith.subf %332, %335 : vector<8x16xf32>
    %337 = math.exp %336 : vector<8x16xf32>
    %cst_91 = arith.constant dense<0.000000e+00> : vector<8xf32>
    %338 = vector.multi_reduction <add>, %337, %cst_91 [1] : vector<8x16xf32> to vector<8xf32>
    %339 = vector.shape_cast %338 : vector<8xf32> to vector<8x1xf32>
    %c0_92 = arith.constant 0 : index
    %c80_93 = arith.constant 80 : index
    %340 = vector.load %arg1[%c0_92, %c80_93] : memref<8x128xf32, #tpu.memory_space<vmem>>, vector<8x16xf32>
    %341 = arith.mulf %337, %340 : vector<8x16xf32>
    %cst_94 = arith.constant dense<0.000000e+00> : vector<8x128xf32>
    %342 = tpu.matmul %341, %0, %cst_94 {dimension_numbers = #tpu.dot_dimension_numbers<[1], [0], [0], [1], [0, 0, 1, 1], [], []>} : vector<8x16xf32>, vector<16x128xf32>, vector<8x128xf32> -> vector<8x128xf32>
    %cst_95 = arith.constant dense<0.000000e+00> : vector<8x128xf32>
    %343 = tpu.matmul %319, %1, %cst_95 {dimension_numbers = #tpu.dot_dimension_numbers<[1], [0], [0], [1], [0, 0, 1, 1], [], []>} : vector<8x32xf32>, vector<32x128xf32>, vector<8x128xf32> -> vector<8x128xf32>
    %344 = tpu.reciprocal %339 : vector<8x1xf32> -> vector<8x1xf32>
    %345 = vector.broadcast %344 : vector<8x1xf32> to vector<8x128xf32>
    %346 = arith.mulf %342, %345 : vector<8x128xf32>
    %347 = arith.addf %346, %343 : vector<8x128xf32>
    %348 = vector.broadcast %2 : vector<1x128xf32> to vector<8x128xf32>
    %349 = arith.addf %347, %348 : vector<8x128xf32>
    %350 = vector.extract_strided_slice %349 {offsets = [0, 0], sizes = [8, 32], strides = [1, 1]} : vector<8x128xf32> to vector<8x32xf32>
    %351 = arith.negf %350 : vector<8x32xf32>
    %352 = math.exp %351 : vector<8x32xf32>
    %cst_96 = arith.constant 1.000000e+00 : f32
    %353 = vector.broadcast %cst_96 : f32 to vector<8x32xf32>
    %354 = arith.addf %353, %352 : vector<8x32xf32>
    %355 = arith.divf %353, %354 : vector<8x32xf32>
    %356 = vector.extract_strided_slice %349 {offsets = [0, 32], sizes = [8, 32], strides = [1, 1]} : vector<8x128xf32> to vector<8x32xf32>
    %357 = arith.negf %356 : vector<8x32xf32>
    %358 = math.exp %357 : vector<8x32xf32>
    %cst_97 = arith.constant 1.000000e+00 : f32
    %359 = vector.broadcast %cst_97 : f32 to vector<8x32xf32>
    %360 = arith.addf %359, %358 : vector<8x32xf32>
    %361 = arith.divf %359, %360 : vector<8x32xf32>
    %362 = vector.extract_strided_slice %349 {offsets = [0, 64], sizes = [8, 32], strides = [1, 1]} : vector<8x128xf32> to vector<8x32xf32>
    %363 = math.tanh %362 : vector<8x32xf32>
    %364 = vector.extract_strided_slice %349 {offsets = [0, 96], sizes = [8, 32], strides = [1, 1]} : vector<8x128xf32> to vector<8x32xf32>
    %365 = arith.negf %364 : vector<8x32xf32>
    %366 = math.exp %365 : vector<8x32xf32>
    %cst_98 = arith.constant 1.000000e+00 : f32
    %367 = vector.broadcast %cst_98 : f32 to vector<8x32xf32>
    %368 = arith.addf %367, %366 : vector<8x32xf32>
    %369 = arith.divf %367, %368 : vector<8x32xf32>
    %370 = arith.mulf %361, %317 : vector<8x32xf32>
    %371 = arith.mulf %355, %363 : vector<8x32xf32>
    %372 = arith.addf %370, %371 : vector<8x32xf32>
    %373 = math.tanh %372 : vector<8x32xf32>
    %374 = arith.mulf %369, %373 : vector<8x32xf32>
    %375 = vector.broadcast %344 : vector<8x1xf32> to vector<8x16xf32>
    %376 = arith.mulf %341, %375 : vector<8x16xf32>
    %c0_99 = arith.constant 0 : index
    %c80_100 = arith.constant 80 : index
    %377 = vector.load %arg7[%c0_99, %c80_100] : memref<8x128xf32, #tpu.memory_space<vmem>>, vector<8x16xf32>
    tpu.vector_store %arg7[%c0_99, %c80_100], %376 {strides = array<i32>} : memref<8x128xf32, #tpu.memory_space<vmem>>, vector<8x16xf32>,
    %c0_101 = arith.constant 0 : index
    %c160 = arith.constant 160 : index
    %378 = vector.load %arg8[%c0_101, %c160] : memref<8x256xf32, #tpu.memory_space<vmem>>, vector<8x32xf32>
    tpu.vector_store %arg8[%c0_101, %c160], %374 {strides = array<i32>} : memref<8x256xf32, #tpu.memory_space<vmem>>, vector<8x32xf32>,
    %379 = vector.broadcast %3 : vector<1x32xf32> to vector<8x32xf32>
    %380 = arith.mulf %374, %379 : vector<8x32xf32>
    %381 = vector.broadcast %4 : vector<1x32xf32> to vector<8x32xf32>
    %382 = arith.mulf %372, %381 : vector<8x32xf32>
    %383 = arith.addf %380, %382 : vector<8x32xf32>
    %cst_102 = arith.constant dense<0.000000e+00> : vector<8xf32>
    %384 = vector.multi_reduction <add>, %383, %cst_102 [1] : vector<8x32xf32> to vector<8xf32>
    %385 = vector.shape_cast %384 : vector<8xf32> to vector<8x1xf32>
    %386 = vector.broadcast %385 : vector<8x1xf32> to vector<8x16xf32>
    %387 = arith.addf %46, %386 : vector<8x16xf32>
    %cst_103 = arith.constant dense<0xFF800000> : vector<8xf32>
    %388 = vector.multi_reduction <maximumf>, %387, %cst_103 [1] : vector<8x16xf32> to vector<8xf32>
    %389 = vector.shape_cast %388 : vector<8xf32> to vector<8x1xf32>
    %390 = vector.broadcast %389 : vector<8x1xf32> to vector<8x16xf32>
    %391 = arith.subf %387, %390 : vector<8x16xf32>
    %392 = math.exp %391 : vector<8x16xf32>
    %cst_104 = arith.constant dense<0.000000e+00> : vector<8xf32>
    %393 = vector.multi_reduction <add>, %392, %cst_104 [1] : vector<8x16xf32> to vector<8xf32>
    %394 = vector.shape_cast %393 : vector<8xf32> to vector<8x1xf32>
    %c0_105 = arith.constant 0 : index
    %c96_106 = arith.constant 96 : index
    %395 = vector.load %arg1[%c0_105, %c96_106] : memref<8x128xf32, #tpu.memory_space<vmem>>, vector<8x16xf32>
    %396 = arith.mulf %392, %395 : vector<8x16xf32>
    %cst_107 = arith.constant dense<0.000000e+00> : vector<8x128xf32>
    %397 = tpu.matmul %396, %0, %cst_107 {dimension_numbers = #tpu.dot_dimension_numbers<[1], [0], [0], [1], [0, 0, 1, 1], [], []>} : vector<8x16xf32>, vector<16x128xf32>, vector<8x128xf32> -> vector<8x128xf32>
    %cst_108 = arith.constant dense<0.000000e+00> : vector<8x128xf32>
    %398 = tpu.matmul %374, %1, %cst_108 {dimension_numbers = #tpu.dot_dimension_numbers<[1], [0], [0], [1], [0, 0, 1, 1], [], []>} : vector<8x32xf32>, vector<32x128xf32>, vector<8x128xf32> -> vector<8x128xf32>
    %399 = tpu.reciprocal %394 : vector<8x1xf32> -> vector<8x1xf32>
    %400 = vector.broadcast %399 : vector<8x1xf32> to vector<8x128xf32>
    %401 = arith.mulf %397, %400 : vector<8x128xf32>
    %402 = arith.addf %401, %398 : vector<8x128xf32>
    %403 = vector.broadcast %2 : vector<1x128xf32> to vector<8x128xf32>
    %404 = arith.addf %402, %403 : vector<8x128xf32>
    %405 = vector.extract_strided_slice %404 {offsets = [0, 0], sizes = [8, 32], strides = [1, 1]} : vector<8x128xf32> to vector<8x32xf32>
    %406 = arith.negf %405 : vector<8x32xf32>
    %407 = math.exp %406 : vector<8x32xf32>
    %cst_109 = arith.constant 1.000000e+00 : f32
    %408 = vector.broadcast %cst_109 : f32 to vector<8x32xf32>
    %409 = arith.addf %408, %407 : vector<8x32xf32>
    %410 = arith.divf %408, %409 : vector<8x32xf32>
    %411 = vector.extract_strided_slice %404 {offsets = [0, 32], sizes = [8, 32], strides = [1, 1]} : vector<8x128xf32> to vector<8x32xf32>
    %412 = arith.negf %411 : vector<8x32xf32>
    %413 = math.exp %412 : vector<8x32xf32>
    %cst_110 = arith.constant 1.000000e+00 : f32
    %414 = vector.broadcast %cst_110 : f32 to vector<8x32xf32>
    %415 = arith.addf %414, %413 : vector<8x32xf32>
    %416 = arith.divf %414, %415 : vector<8x32xf32>
    %417 = vector.extract_strided_slice %404 {offsets = [0, 64], sizes = [8, 32], strides = [1, 1]} : vector<8x128xf32> to vector<8x32xf32>
    %418 = math.tanh %417 : vector<8x32xf32>
    %419 = vector.extract_strided_slice %404 {offsets = [0, 96], sizes = [8, 32], strides = [1, 1]} : vector<8x128xf32> to vector<8x32xf32>
    %420 = arith.negf %419 : vector<8x32xf32>
    %421 = math.exp %420 : vector<8x32xf32>
    %cst_111 = arith.constant 1.000000e+00 : f32
    %422 = vector.broadcast %cst_111 : f32 to vector<8x32xf32>
    %423 = arith.addf %422, %421 : vector<8x32xf32>
    %424 = arith.divf %422, %423 : vector<8x32xf32>
    %425 = arith.mulf %416, %372 : vector<8x32xf32>
    %426 = arith.mulf %410, %418 : vector<8x32xf32>
    %427 = arith.addf %425, %426 : vector<8x32xf32>
    %428 = math.tanh %427 : vector<8x32xf32>
    %429 = arith.mulf %424, %428 : vector<8x32xf32>
    %430 = vector.broadcast %399 : vector<8x1xf32> to vector<8x16xf32>
    %431 = arith.mulf %396, %430 : vector<8x16xf32>
    %c0_112 = arith.constant 0 : index
    %c96_113 = arith.constant 96 : index
    %432 = vector.load %arg7[%c0_112, %c96_113] : memref<8x128xf32, #tpu.memory_space<vmem>>, vector<8x16xf32>
    tpu.vector_store %arg7[%c0_112, %c96_113], %431 {strides = array<i32>} : memref<8x128xf32, #tpu.memory_space<vmem>>, vector<8x16xf32>,
    %c0_114 = arith.constant 0 : index
    %c192 = arith.constant 192 : index
    %433 = vector.load %arg8[%c0_114, %c192] : memref<8x256xf32, #tpu.memory_space<vmem>>, vector<8x32xf32>
    tpu.vector_store %arg8[%c0_114, %c192], %429 {strides = array<i32>} : memref<8x256xf32, #tpu.memory_space<vmem>>, vector<8x32xf32>,
    %434 = vector.broadcast %3 : vector<1x32xf32> to vector<8x32xf32>
    %435 = arith.mulf %429, %434 : vector<8x32xf32>
    %436 = vector.broadcast %4 : vector<1x32xf32> to vector<8x32xf32>
    %437 = arith.mulf %427, %436 : vector<8x32xf32>
    %438 = arith.addf %435, %437 : vector<8x32xf32>
    %cst_115 = arith.constant dense<0.000000e+00> : vector<8xf32>
    %439 = vector.multi_reduction <add>, %438, %cst_115 [1] : vector<8x32xf32> to vector<8xf32>
    %440 = vector.shape_cast %439 : vector<8xf32> to vector<8x1xf32>
    %441 = vector.broadcast %440 : vector<8x1xf32> to vector<8x16xf32>
    %442 = arith.addf %46, %441 : vector<8x16xf32>
    %cst_116 = arith.constant dense<0xFF800000> : vector<8xf32>
    %443 = vector.multi_reduction <maximumf>, %442, %cst_116 [1] : vector<8x16xf32> to vector<8xf32>
    %444 = vector.shape_cast %443 : vector<8xf32> to vector<8x1xf32>
    %445 = vector.broadcast %444 : vector<8x1xf32> to vector<8x16xf32>
    %446 = arith.subf %442, %445 : vector<8x16xf32>
    %447 = math.exp %446 : vector<8x16xf32>
    %cst_117 = arith.constant dense<0.000000e+00> : vector<8xf32>
    %448 = vector.multi_reduction <add>, %447, %cst_117 [1] : vector<8x16xf32> to vector<8xf32>
    %449 = vector.shape_cast %448 : vector<8xf32> to vector<8x1xf32>
    %c0_118 = arith.constant 0 : index
    %c112_119 = arith.constant 112 : index
    %450 = vector.load %arg1[%c0_118, %c112_119] : memref<8x128xf32, #tpu.memory_space<vmem>>, vector<8x16xf32>
    %451 = arith.mulf %447, %450 : vector<8x16xf32>
    %cst_120 = arith.constant dense<0.000000e+00> : vector<8x128xf32>
    %452 = tpu.matmul %451, %0, %cst_120 {dimension_numbers = #tpu.dot_dimension_numbers<[1], [0], [0], [1], [0, 0, 1, 1], [], []>} : vector<8x16xf32>, vector<16x128xf32>, vector<8x128xf32> -> vector<8x128xf32>
    %cst_121 = arith.constant dense<0.000000e+00> : vector<8x128xf32>
    %453 = tpu.matmul %429, %1, %cst_121 {dimension_numbers = #tpu.dot_dimension_numbers<[1], [0], [0], [1], [0, 0, 1, 1], [], []>} : vector<8x32xf32>, vector<32x128xf32>, vector<8x128xf32> -> vector<8x128xf32>
    %454 = tpu.reciprocal %449 : vector<8x1xf32> -> vector<8x1xf32>
    %455 = vector.broadcast %454 : vector<8x1xf32> to vector<8x128xf32>
    %456 = arith.mulf %452, %455 : vector<8x128xf32>
    %457 = arith.addf %456, %453 : vector<8x128xf32>
    %458 = vector.broadcast %2 : vector<1x128xf32> to vector<8x128xf32>
    %459 = arith.addf %457, %458 : vector<8x128xf32>
    %460 = vector.extract_strided_slice %459 {offsets = [0, 0], sizes = [8, 32], strides = [1, 1]} : vector<8x128xf32> to vector<8x32xf32>
    %461 = arith.negf %460 : vector<8x32xf32>
    %462 = math.exp %461 : vector<8x32xf32>
    %cst_122 = arith.constant 1.000000e+00 : f32
    %463 = vector.broadcast %cst_122 : f32 to vector<8x32xf32>
    %464 = arith.addf %463, %462 : vector<8x32xf32>
    %465 = arith.divf %463, %464 : vector<8x32xf32>
    %466 = vector.extract_strided_slice %459 {offsets = [0, 32], sizes = [8, 32], strides = [1, 1]} : vector<8x128xf32> to vector<8x32xf32>
    %467 = arith.negf %466 : vector<8x32xf32>
    %468 = math.exp %467 : vector<8x32xf32>
    %cst_123 = arith.constant 1.000000e+00 : f32
    %469 = vector.broadcast %cst_123 : f32 to vector<8x32xf32>
    %470 = arith.addf %469, %468 : vector<8x32xf32>
    %471 = arith.divf %469, %470 : vector<8x32xf32>
    %472 = vector.extract_strided_slice %459 {offsets = [0, 64], sizes = [8, 32], strides = [1, 1]} : vector<8x128xf32> to vector<8x32xf32>
    %473 = math.tanh %472 : vector<8x32xf32>
    %474 = vector.extract_strided_slice %459 {offsets = [0, 96], sizes = [8, 32], strides = [1, 1]} : vector<8x128xf32> to vector<8x32xf32>
    %475 = arith.negf %474 : vector<8x32xf32>
    %476 = math.exp %475 : vector<8x32xf32>
    %cst_124 = arith.constant 1.000000e+00 : f32
    %477 = vector.broadcast %cst_124 : f32 to vector<8x32xf32>
    %478 = arith.addf %477, %476 : vector<8x32xf32>
    %479 = arith.divf %477, %478 : vector<8x32xf32>
    %480 = arith.mulf %471, %427 : vector<8x32xf32>
    %481 = arith.mulf %465, %473 : vector<8x32xf32>
    %482 = arith.addf %480, %481 : vector<8x32xf32>
    %483 = math.tanh %482 : vector<8x32xf32>
    %484 = arith.mulf %479, %483 : vector<8x32xf32>
    %485 = vector.broadcast %454 : vector<8x1xf32> to vector<8x16xf32>
    %486 = arith.mulf %451, %485 : vector<8x16xf32>
    %c0_125 = arith.constant 0 : index
    %c112_126 = arith.constant 112 : index
    %487 = vector.load %arg7[%c0_125, %c112_126] : memref<8x128xf32, #tpu.memory_space<vmem>>, vector<8x16xf32>
    tpu.vector_store %arg7[%c0_125, %c112_126], %486 {strides = array<i32>} : memref<8x128xf32, #tpu.memory_space<vmem>>, vector<8x16xf32>,
    %c0_127 = arith.constant 0 : index
    %c224 = arith.constant 224 : index
    %488 = vector.load %arg8[%c0_127, %c224] : memref<8x256xf32, #tpu.memory_space<vmem>>, vector<8x32xf32>
    tpu.vector_store %arg8[%c0_127, %c224], %484 {strides = array<i32>} : memref<8x256xf32, #tpu.memory_space<vmem>>, vector<8x32xf32>,
    return
  }
  func.func @transform_0(%arg0: i32) -> (i32, i32) {
    %c0_i32 = arith.constant 0 : i32
    %c0_i32_0 = arith.constant 0 : i32
    return %arg0, %c0_i32 : i32, i32
  }
  func.func @transform_1(%arg0: i32) -> (i32, i32) {
    %c0_i32 = arith.constant 0 : i32
    %c0_i32_0 = arith.constant 0 : i32
    %c0_i32_1 = arith.constant 0 : i32
    return %c0_i32, %c0_i32_0 : i32, i32
  }
  func.func @transform_2(%arg0: i32) -> (i32, i32) {
    %c0_i32 = arith.constant 0 : i32
    %c0_i32_0 = arith.constant 0 : i32
    %c0_i32_1 = arith.constant 0 : i32
    return %c0_i32, %c0_i32_0 : i32, i32
  }
  func.func @transform_3(%arg0: i32) -> (i32, i32) {
    %c0_i32 = arith.constant 0 : i32
    %c0_i32_0 = arith.constant 0 : i32
    %c0_i32_1 = arith.constant 0 : i32
    return %c0_i32, %c0_i32_0 : i32, i32
  }
  func.func @transform_4(%arg0: i32) -> (i32, i32) {
    %c0_i32 = arith.constant 0 : i32
    %c0_i32_0 = arith.constant 0 : i32
    %c0_i32_1 = arith.constant 0 : i32
    return %c0_i32, %c0_i32_0 : i32, i32
  }
  func.func @transform_5(%arg0: i32) -> i32 {
    %c0_i32 = arith.constant 0 : i32
    %c0_i32_0 = arith.constant 0 : i32
    return %c0_i32 : i32
  }
  func.func @transform_6(%arg0: i32) -> (i32, i32) {
    %c0_i32 = arith.constant 0 : i32
    %c0_i32_0 = arith.constant 0 : i32
    return %arg0, %c0_i32 : i32, i32
  }
  func.func @transform_7(%arg0: i32) -> (i32, i32) {
    %c0_i32 = arith.constant 0 : i32
    %c0_i32_0 = arith.constant 0 : i32
    return %arg0, %c0_i32 : i32, i32
  }
}

</mosaic_0001>

<bundles_post_ra>
// kernel: encoder_pallas.1
= control target key start
LH: loop header
LB: loop body
LE: loop exit
PB: predicated region body
PF: predicated region fallthrough
CT: control target
= control target key end

     0   :  { %13 = vsyncpa [#allocation3], 0  ;;  %s1404_s27 = smov [#allocation2]   ;;  %s1887_s0 = inlined_call_operand.vmem [shape: f32[8,128], index: 0, kind: input, shape index: {}]   ;;  %s1888_s1 = inlined_call_operand.vmem [shape: f32[16,128], index: 1, kind: input, shape index: {}]   ;;  %s1889_s2 = inlined_call_operand.vmem [shape: f32[32,128], index: 2, kind: input, shape index: {}]   ;;  %s1890_s3 = inlined_call_operand.vmem [shape: f32[1,128], index: 3, kind: input, shape index: {}]   ;;  %s1891_s4 = inlined_call_operand.vmem [shape: f32[1,64], index: 4, kind: input, shape index: {}]   ;;  %s1892_s5 = inlined_call_operand.vmem [shape: f32[9], index: 5, kind: input, shape index: {}]   ;;  %s1893_s6 = inlined_call_operand.vmem [shape: f32[8,128], index: 6, kind: output, shape index: {0}]   ;;  %s1894_s7 = inlined_call_operand.vmem [shape: f32[8,256], index: 7, kind: output, shape index: {1}]  }
   0x1   :  { %s29_s26 = sshll.u32 %s1892_s5, 4  ;;  %s30_s26 = int_to_ptr.vmem [resolvable:$true] %s29_s26 }
   0x2   :  { %32 = dma.vmem_to_smem %s30_s26, 16, %s1404_s27, [#allocation3]  }
   0x3   :  { %1402 = dma.done.wait [#allocation3], 16  }
   0x4   :  { %1403 = vsyncadd [#allocation3], 4294967280 }
   0x5   :  { %37 = sfence }
   0x6   :  { %v1459_v0 = vld [vmem:[%s1891_s4] ss:$0 sm:$0xff]  ;;  %s1251_s30 = sld [smem:[#allocation2 + $0x2]]  ;;  %s1405_s10 = smov 96   ;;  %vm118_vm0 = vcmask 261120   ;;  %vm123_vm1 = vcmask 130048  }
   0x7   :  { %v112_v1 = vmul.f32 0.0, %v1459_v0  ;;  %s1250_s8 = sld [smem:[#allocation2 + $0x1]]  ;;  %v1466_v2 = vld [vmem:[%s1887_s0] sm:$0xff]  ;;  %s1406_s16 = smov 112   ;;  %v1491_v41 = vld [vmem:[%s1888_s1 + $0x8] sm:$0xff]  ;;  %v1505_v43 = vld [vmem:[%s1889_s2 + $0x18] sm:$0xff] }
   0x8   :  { %s1252_s9 = sld [smem:[#allocation2 + $0x3]]  ;;  %s1407_s17 = smov 64   ;;  %151 = vmatpush.msra.mxu0 %v1491_v41  ;;  %294 = vmatpush.msra.mxu2 %v1491_v41  ;;  %v1498_v42 = vld [vmem:[%s1888_s1] sm:$0xff]  ;;  %v1510_v44 = vld [vmem:[%s1889_s2 + $0x10] sm:$0xff]  ;;  %v1518_v45 = vld [vmem:[%s1889_s2 + $0x8] sm:$0xff]  ;;  %v1412_v47 = vmov 0.0  }
   0x9   :  { %114 = vrot.lane.b32.xlu0 %v112_v1, %s1405_s10  ;;  %s1255_s12 = sld [smem:[#allocation2 + $0x6]]  ;;  %s1408_s18 = smov 80   ;;  %172 = vmatpush.msra.mxu1 %v1505_v43  ;;  %v1527_v46 = vld [vmem:[%s1889_s2] sm:$0xff] }
   0xa   :  { %s1253_s13 = sld [smem:[#allocation2 + $0x4]]  ;;  %s1409_s19 = smov 32   ;;  %152 = vmatpush.msra.mxu0 %v1498_v42  ;;  %295 = vmatpush.msra.mxu2 %v1498_v42 }
   0xb   :  { %s1254_s14 = sld [smem:[#allocation2 + $0x5]]  ;;  %s1410_s20 = smov 48   ;;  %314 = vmatpush.msra.mxu3 %v1505_v43  ;;  %173 = vmatpush.msra.mxu1 %v1510_v44 }
   0xc   :  { %v62_v3 = vstv %s1251_s30  ;;  %s1256_s15 = sld [smem:[#allocation2 + $0x7]]  ;;  %s1411_s21 = smov 16   ;;  %436 = vmatpush.msrb.mxu0 %v1491_v41  ;;  %458 = vmatpush.msrb.mxu2 %v1505_v43 }
   0xd   :  { %v63_v4 = vmul.f32 %v62_v3, %v1466_v2  ;;  %v54_v5 = vstv %s1250_s8  ;;  %s47_s22 = sld [smem:[#allocation2]]  ;;  %315 = vmatpush.msra.mxu3 %v1510_v44  ;;  %174 = vmatpush.msra.mxu1 %v1518_v45 }
   0xe   :  { %v55_v6 = vmul.f32 %v54_v5, %v1466_v2  ;;  %v70_v7 = vstv %s1252_s9  ;;  %s1249_s23 = sld [smem:[#allocation2 + $0x8]]  ;;  %437 = vmatpush.msrb.mxu0 %v1498_v42  ;;  %459 = vmatpush.msrb.mxu2 %v1510_v44 }
   0xf   :  { %65 = vrot.lane.b32.xlu1 %v63_v4, %s1405_s10  ;;  %v94_v9 = vstv %s1255_s12  ;;  %v71_v11 = vmul.f32 %v70_v7, %v1466_v2  ;;  %316 = vmatpush.msra.mxu3 %v1518_v45  ;;  %v1552_v7 = vld [vmem:[%s1890_s3] ss:$0 sm:$0xff] }
  0x10   :  { %v78_v8 = vstv %s1253_s13  ;;  %v95_v12 = vmul.f32 %v94_v9, %v1466_v2  ;;  %460 = vmatpush.msrb.mxu2 %v1518_v45  ;;  %175 = vmatpush.msra.mxu1 %v1527_v46 }
  0x11   :  { %57 = vrot.lane.b32.xlu0 %v55_v6, %s1406_s16  ;;  %v79_v10 = vmul.f32 %v78_v8, %v1466_v2  ;;  %v86_v13 = vstv %s1254_s14  ;;  %317 = vmatpush.msra.mxu3 %v1527_v46 }
  0x12   :  { %v102_v14 = vstv %s1256_s15  ;;  %v87_v15 = vmul.f32 %v86_v13, %v1466_v2  ;;  %176 = vmatmul.f32.vlgmr.msra.gmra.mxu1 %v1412_v47  ;;  %461 = vmatpush.msrb.mxu2 %v1527_v46 }
  0x13   :  { %81 = vrot.lane.b32.xlu2 %v79_v10, %s1407_s17  ;;  %v103_v16 = vmul.f32 %v102_v14, %v1466_v2  ;;  %v48_v20 = vstv %s47_s22  ;;  %602 = vmatpush.msrb.mxu3 %v1505_v43 }
  0x14   :  { %v49_v21 = vmul.f32 %v48_v20, %v1466_v2  ;;  %v51_v22 = vstv %s1249_s23  ;;  %580 = vmatpush.msrb.mxu1 %v1491_v41 }
  0x15   :  { %603 = vmatpush.msrb.mxu3 %v1510_v44 }
  0x16   :  { %v52_v24 = vadd.f32 %v51_v22, %v49_v21  ;;  %581 = vmatpush.msrb.mxu1 %v1498_v42 }
  0x17   :  { %73 = vrot.lane.b32.xlu1 %v71_v11, %s1408_s18  ;;  %604 = vmatpush.msrb.mxu3 %v1518_v45 }
  0x18   :  { %864 = vmatpush.msra.mxu1 %v1491_v41 }
  0x19   :  { %97 = vrot.lane.b32.xlu0 %v95_v12, %s1409_s19  ;;  %605 = vmatpush.msrb.mxu3 %v1527_v46 }
  0x1a   :  { %865 = vmatpush.msra.mxu1 %v1498_v42 }
  0x1b   :  { %89 = vrot.lane.b32.xlu2 %v87_v15, %s1410_s20 }
  0x1f   :  { %105 = vrot.lane.b32.xlu1 %v103_v16, %s1411_s21 }
  0x6d   :  { %v82_v27 = vpop.permute.xlu2 %81 }
  0x75   :  { %v90_v32 = vpop.permute.xlu2 %89 }
  0x7b   :  { %v115_v17 = vpop.permute.xlu0 %114 }
  0x7c   :  { %v117_v18 = vadd.f32 %v115_v17, %v112_v1 }
  0x7e   :  { %v119_v19 = vsel %vm118_vm0, %v117_v18, 0.0 }
  0x7f   :  { %120 = vadd.xlane.f32.xlu2 %v119_v19 }
  0x81   :  { %v66_v23 = vpop.permute.xlu1 %65 }
  0x83   :  { %v58_v25 = vpop.permute.xlu0 %57 }
  0x84   :  { %v60_v26 = vadd.f32 %v58_v25, %v52_v24 }
  0x86   :  { %v68_v28 = vadd.f32 %v66_v23, %v60_v26 }
  0x89   :  { %v74_v29 = vpop.permute.xlu1 %73 }
  0x8a   :  { %v76_v30 = vadd.f32 %v74_v29, %v68_v28 }
  0x8b   :  { %v98_v34 = vpop.permute.xlu0 %97 }
  0x8c   :  { %v84_v31 = vadd.f32 %v82_v27, %v76_v30 }
  0x8e   :  { %v92_v33 = vadd.f32 %v90_v32, %v84_v31 }
  0x8f   :  { %v177_v4 = vpop.f32.mrf.mxu1 }
  0x90   :  { %v100_v35 = vadd.f32 %v98_v34, %v92_v33 }
  0x91   :  { %v106_v36 = vpop.permute.xlu1 %105 }
  0x92   :  { %v1484_v37 = vadd.f32 %v106_v36, %v100_v35 }
  0xf2   :  { %v121_v38 = vpop.xlane.xlu2 %120 }
  0xf3   :  { %v122_v39 = vadd.f32 %v121_v38, %v1484_v37 }
  0xf5   :  { %v124_v40 = vsel %vm123_vm1, %v122_v39, -inf }
  0xf6   :  { %125 = vmax.xlane.f32.xlu0 %v124_v40 }
 0x169   :  { %v126_v48 = vpop.xlane.xlu0 %125 }
 0x16a   :  { %v127_v49 = vsub.f32 %v122_v39, %v126_v48 }
 0x16c   :  { %v128_v50 = vmul.f32 1.442695, %v127_v49 }
 0x16e   :  { %1291 = vpow2.f32 %v128_v50 }
 0x174   :  { %v1292_v51 = vpop.eup %1291 }
 0x175   :  { %v130_v52 = vsel %vm123_vm1, %v1292_v51, 0.0  ;;  %v133_v53 = vmul.f32 %v1292_v51, %v1466_v2 }
 0x176   :  { %131 = vadd.xlane.f32.xlu1 %v130_v52 }
 0x177   :  { %1257 = vmatmul.msk.f32.vlgmr.msra.gmra.mxu0 %vm123_vm1, %v133_v53 }
 0x178   :  { %720 = vmatpush.msra.mxu0 %v1491_v41 }
 0x17a   :  { %721 = vmatpush.msra.mxu0 %v1498_v42 }
 0x1e9   :  { %v132_v54 = vpop.xlane.xlu1 %131 }
 0x1ea   :  { %1293 = vrcp.f32 %v132_v54  ;;  %v191_v58 = vand.u32 2147483648, %v132_v54  ;;  %v189_v60 = vand.u32 2147483647, %v132_v54  ;;  %vm185_vm3 = vweird.f32 %v132_v54 }
 0x1ec   :  { %v192_v62 = vor.u32 1.1754944e-38, %v191_v58  ;;  %vm190_vm5 = vcmp.eq.f32.partialorder %v189_v60, 8.507059e+37 }
 0x1f0   :  { %v1294_v55 = vpop.eup %1293 }
 0x1f1   :  { %v181_v56 = vmul.f32 %v1294_v55, %v132_v54  ;;  %vm186_vm2 = vweird.f32 %v1294_v55 }
 0x1f2   :  { %vm187_vm4 = vmor %vm185_vm3, %vm186_vm2 }
 0x1f3   :  { %v182_v57 = vsub.f32 1.0, %v181_v56 }
 0x1f4   :  { %v154_v1 = vpop.f32.mrf.mxu0 }
 0x1f5   :  { %v183_v59 = vmul.f32 %v1294_v55, %v182_v57 }
 0x1f7   :  { %v184_v61 = vadd.f32 %v1294_v55, %v183_v59 }
 0x1f9   :  { %v188_v63 = vsel %vm187_vm4, %v1294_v55, %v184_v61 }
 0x1fa   :  { %v193_v3 = vsel %vm190_vm5, %v192_v62, %v188_v63 }
 0x1fb   :  { %v194_v5 = vmul.f32 %v193_v3, %v154_v1  ;;  %v237_v6 = vmul.f32 %v193_v3, %v133_v53 }
 0x1fd   :  { %238 = vst.msk [vmem:[%s1893_s6] sm:$0xff] %vm123_vm1, %v237_v6  ;;  %v195_v8 = vadd.f32 %v194_v5, %v177_v4 }
 0x1ff   :  { %v199_v9 = vadd.f32 %v1552_v7, %v195_v8 }
 0x201   :  { %1295 = vtanh.f32 %v199_v9  ;;  %v1258_v11 = vmul.f32 -1.442695, %v199_v9 }
 0x203   :  { %1297 = vpow2.f32 %v1258_v11 }
 0x207   :  { %v1296_v10 = vpop.eup %1295 }
 0x208   :  { %222 = vrot.lane.b32.xlu2 %v1296_v10, %s1407_s17 }
 0x209   :  { %v1298_v12 = vpop.eup %1297 }
 0x20a   :  { %v203_v13 = vadd.f32 1.0, %v1298_v12 }
 0x20c   :  { %1299 = vrcp.f32 %v203_v13  ;;  %v215_v19 = vand.u32 2147483648, %v203_v13  ;;  %vm209_vm7 = vweird.f32 %v203_v13  ;;  %v213_v20 = vand.u32 2147483647, %v203_v13 }
 0x20e   :  { %v216_v22 = vor.u32 1.1754944e-38, %v215_v19  ;;  %vm214_vm9 = vcmp.eq.f32.partialorder %v213_v20, 8.507059e+37 }
 0x210   :  { %244 = vrot.lane.b32.xlu2 %v1459_v0, %s1405_s10 }
 0x212   :  { %v1300_v14 = vpop.eup %1299 }
 0x213   :  { %v205_v15 = vmul.f32 %v1300_v14, %v203_v13  ;;  %vm210_vm6 = vweird.f32 %v1300_v14 }
 0x214   :  { %vm211_vm8 = vmor %vm209_vm7, %vm210_vm6 }
 0x215   :  { %v206_v16 = vsub.f32 1.0, %v205_v15 }
 0x217   :  { %v207_v17 = vmul.f32 %v1300_v14, %v206_v16 }
 0x219   :  { %v208_v18 = vadd.f32 %v1300_v14, %v207_v17 }
 0x21b   :  { %v212_v21 = vsel %vm211_vm8, %v1300_v14, %v208_v18 }
 0x21c   :  { %v217_v24 = vsel %vm214_vm9, %v216_v22, %v212_v21 }
 0x21d   :  { %v220_v26 = vmul.f32 0.0, %v217_v24 }
 0x262   :  { %v223_v23 = vpop.permute.xlu2 %222 }
 0x263   :  { %v225_v25 = vmul.f32 %v223_v23, %v217_v24 }
 0x265   :  { %227 = vrot.lane.b32.xlu0 %v225_v25, %s1409_s19 }
 0x26a   :  { %v1570_v32 = vpop.permute.xlu2 %244 }
 0x2d7   :  { %v228_v27 = vpop.permute.xlu0 %227 }
 0x2d8   :  { %v1563_v28 = vadd.f32 %v228_v27, %v220_v26 }
 0x2da   :  { %1301 = vtanh.f32 %v1563_v28  ;;  %v248_v29 = vmul.f32 %v1459_v0, %v1563_v28 }
 0x2dc   :  { %250 = vrot.lane.b32.xlu0 %v248_v29, %s1407_s17 }
 0x2e0   :  { %v1302_v30 = vpop.eup %1301 }
 0x2e1   :  { %233 = vrot.lane.b32.xlu1 %v1302_v30, %s1407_s17 }
 0x34e   :  { %v251_v35 = vpop.permute.xlu0 %250 }
 0x353   :  { %v234_v31 = vpop.permute.xlu1 %233 }
 0x354   :  { %v236_v33 = vmul.f32 %v234_v31, %v217_v24 }
 0x356   :  { %v247_v34 = vmul.f32 %v1570_v32, %v236_v33 }
 0x358   :  { %v253_v36 = vadd.f32 %v251_v35, %v247_v34 }
 0x35a   :  { %255 = vrot.lane.b32.xlu2 %v253_v36, %s1409_s19 }
 0x362   :  { %273 = vrot.lane.b32.xlu2 %v1466_v2, %s1406_s16 }
 0x36a   :  { %240 = vrot.lane.b32.xlu2 %v236_v33, %s1409_s19 }
 0x3b4   :  { %v256_v38 = vpop.permute.xlu2 %255 }
 0x3b5   :  { %v258_v39 = vsel %vm118_vm0, %v256_v38, 0.0 }
 0x3b6   :  { %259 = vadd.xlane.f32.xlu1 %v258_v39 }
 0x3bc   :  { %v274_v40 = vpop.permute.xlu2 %273 }
 0x3c4   :  { %v241_v47 = vpop.permute.xlu2 %240 }
 0x3c5   :  { %243 = vst.msk [vmem:[%s1894_s7] sm:$0xff] %vm118_vm0, %v241_v47  ;;  %1260 = vmatmul.msk.f32.vlgmr.msra.gmra.mxu3 %vm118_vm0, %v241_v47 }
 0x3c6   :  { %884 = vmatpush.msra.mxu3 %v1505_v43 }
 0x3c8   :  { %885 = vmatpush.msra.mxu3 %v1510_v44 }
 0x3ca   :  { %886 = vmatpush.msra.mxu3 %v1518_v45 }
 0x3cc   :  { %887 = vmatpush.msra.mxu3 %v1527_v46 }
 0x429   :  { %v260_v48 = vpop.xlane.xlu1 %259 }
 0x42a   :  { %v261_v49 = vadd.f32 %v260_v48, %v1484_v37 }
 0x42c   :  { %v262_v50 = vsel %vm123_vm1, %v261_v49, -inf }
 0x42d   :  { %263 = vmax.xlane.f32.xlu0 %v262_v50 }
 0x448   :  { %v319_v9 = vpop.f32.mrf.mxu3 }
 0x4a0   :  { %v264_v51 = vpop.xlane.xlu0 %263 }
 0x4a1   :  { %v265_v52 = vsub.f32 %v261_v49, %v264_v51 }
 0x4a3   :  { %v266_v53 = vmul.f32 1.442695, %v265_v52 }
 0x4a5   :  { %1303 = vpow2.f32 %v266_v53 }
 0x4ab   :  { %v1304_v54 = vpop.eup %1303 }
 0x4ac   :  { %v268_v55 = vsel %vm123_vm1, %v1304_v54, 0.0  ;;  %v1590_v56 = vmul.f32 %v1304_v54, %v274_v40 }
 0x4ad   :  { %269 = vadd.xlane.f32.xlu2 %v268_v55 }
 0x4ae   :  { %1259 = vmatmul.msk.f32.vlgmr.msra.gmra.mxu2 %vm123_vm1, %v1590_v56 }
 0x4af   :  { %743 = vmatpush.msra.mxu2 %v1505_v43 }
 0x4b1   :  { %744 = vmatpush.msra.mxu2 %v1510_v44 }
 0x4b3   :  { %745 = vmatpush.msra.mxu2 %v1518_v45 }
 0x4b5   :  { %746 = vmatpush.msra.mxu2 %v1527_v46 }
 0x520   :  { %v270_v57 = vpop.xlane.xlu2 %269 }
 0x521   :  { %1305 = vrcp.f32 %v270_v57  ;;  %v333_v61 = vand.u32 2147483648, %v270_v57  ;;  %v331_v63 = vand.u32 2147483647, %v270_v57  ;;  %vm327_vm11 = vweird.f32 %v270_v57 }
 0x523   :  { %v334_v3 = vor.u32 1.1754944e-38, %v333_v61  ;;  %vm332_vm13 = vcmp.eq.f32.partialorder %v331_v63, 8.507059e+37 }
 0x527   :  { %v1306_v58 = vpop.eup %1305 }
 0x528   :  { %v323_v59 = vmul.f32 %v1306_v58, %v270_v57  ;;  %vm328_vm10 = vweird.f32 %v1306_v58 }
 0x529   :  { %vm329_vm12 = vmor %vm327_vm11, %vm328_vm10 }
 0x52a   :  { %v324_v60 = vsub.f32 1.0, %v323_v59 }
 0x52c   :  { %v325_v62 = vmul.f32 %v1306_v58, %v324_v60 }
 0x52e   :  { %v326_v1 = vadd.f32 %v1306_v58, %v325_v62 }
 0x530   :  { %v330_v4 = vsel %vm329_vm12, %v1306_v58, %v326_v1 }
 0x531   :  { %v297_v5 = vpop.f32.mrf.mxu2  ;;  %v1598_v6 = vsel %vm332_vm13, %v334_v3, %v330_v4 }
 0x532   :  { %v336_v8 = vmul.f32 %v1598_v6, %v297_v5 }
 0x534   :  { %v337_v10 = vadd.f32 %v336_v8, %v319_v9 }
 0x536   :  { %v338_v11 = vadd.f32 %v1552_v7, %v337_v10 }
 0x538   :  { %1307 = vtanh.f32 %v338_v11  ;;  %v1261_v13 = vmul.f32 -1.442695, %v338_v11 }
 0x53a   :  { %1309 = vpow2.f32 %v1261_v13 }
 0x53e   :  { %v1308_v12 = vpop.eup %1307 }
 0x53f   :  { %361 = vrot.lane.b32.xlu1 %v1308_v12, %s1407_s17 }
 0x540   :  { %v1310_v14 = vpop.eup %1309 }
 0x541   :  { %v342_v15 = vadd.f32 1.0, %v1310_v14 }
 0x543   :  { %1311 = vrcp.f32 %v342_v15  ;;  %v354_v21 = vand.u32 2147483648, %v342_v15  ;;  %vm348_vm15 = vweird.f32 %v342_v15  ;;  %v352_v22 = vand.u32 2147483647, %v342_v15 }
 0x545   :  { %v355_v24 = vor.u32 1.1754944e-38, %v354_v21  ;;  %vm353_vm3 = vcmp.eq.f32.partialorder %v352_v22, 8.507059e+37 }
 0x549   :  { %v1312_v16 = vpop.eup %1311 }
 0x54a   :  { %v344_v17 = vmul.f32 %v1312_v16, %v342_v15  ;;  %vm349_vm14 = vweird.f32 %v1312_v16 }
 0x54b   :  { %vm350_vm2 = vmor %vm348_vm15, %vm349_vm14 }
 0x54c   :  { %v345_v18 = vsub.f32 1.0, %v344_v17 }
 0x54e   :  { %v346_v19 = vmul.f32 %v1312_v16, %v345_v18 }
 0x550   :  { %v347_v20 = vadd.f32 %v1312_v16, %v346_v19 }
 0x552   :  { %v351_v23 = vsel %vm350_vm2, %v1312_v16, %v347_v20 }
 0x553   :  { %v356_v26 = vsel %vm353_vm3, %v355_v24, %v351_v23 }
 0x554   :  { %v359_v29 = vmul.f32 %v356_v26, %v1563_v28 }
 0x5b1   :  { %v362_v25 = vpop.permute.xlu1 %361 }
 0x5b2   :  { %v364_v27 = vmul.f32 %v362_v25, %v356_v26 }
 0x5b4   :  { %366 = vrot.lane.b32.xlu0 %v364_v27, %s1409_s19 }
 0x626   :  { %v367_v30 = vpop.permute.xlu0 %366 }
 0x627   :  { %v1605_v31 = vadd.f32 %v367_v30, %v359_v29 }
 0x629   :  { %1313 = vtanh.f32 %v1605_v31  ;;  %v390_v33 = vmul.f32 %v1459_v0, %v1605_v31 }
 0x62b   :  { %392 = vrot.lane.b32.xlu0 %v390_v33, %s1407_s17 }
 0x62f   :  { %v1314_v34 = vpop.eup %1313 }
 0x630   :  { %372 = vrot.lane.b32.xlu2 %v1314_v34, %s1407_s17 }
 0x68a   :  { %v373_v35 = vpop.permute.xlu2 %372 }
 0x68b   :  { %v1612_v36 = vmul.f32 %v373_v35, %v356_v26 }
 0x68d   :  { %442 = vrot.lane.b32.xlu2 %v1612_v36, %s1409_s19  ;;  %v389_v28 = vmul.f32 %v1612_v36, %v1570_v32 }
 0x695   :  { %415 = vrot.lane.b32.xlu2 %v1466_v2, %s1405_s10 }
 0x69d   :  { %v393_v38 = vpop.permute.xlu0 %392 }
 0x69e   :  { %v395_v39 = vadd.f32 %v393_v38, %v389_v28 }
 0x6a0   :  { %397 = vrot.lane.b32.xlu1 %v395_v39, %s1409_s19 }
 0x6e7   :  { %v443_v40 = vpop.permute.xlu2 %442 }
 0x6e8   :  { %1263 = vmatmul.msk.f32.vlgmr.msrb.gmra.mxu2 %vm118_vm0, %v443_v40 }
 0x6e9   :  { %1027 = vmatpush.msrb.mxu2 %v1505_v43 }
 0x6eb   :  { %1028 = vmatpush.msrb.mxu2 %v1510_v44 }
 0x6ed   :  { %1029 = vmatpush.msrb.mxu2 %v1518_v45 }
 0x6ef   :  { %1030 = vmatpush.msrb.mxu2 %v1527_v46  ;;  %v416_v55 = vpop.permute.xlu2 %415 }
 0x712   :  { %v398_v47 = vpop.permute.xlu1 %397 }
 0x713   :  { %v400_v48 = vsel %vm118_vm0, %v398_v47, 0.0 }
 0x714   :  { %401 = vadd.xlane.f32.xlu0 %v400_v48 }
 0x76b   :  { %v463_v13 = vpop.f32.mrf.mxu2 }
 0x787   :  { %v402_v49 = vpop.xlane.xlu0 %401 }
 0x788   :  { %v403_v50 = vadd.f32 %v402_v49, %v1484_v37 }
 0x78a   :  { %v404_v51 = vsel %vm123_vm1, %v403_v50, -inf }
 0x78b   :  { %405 = vmax.xlane.f32.xlu1 %v404_v51 }
 0x7fe   :  { %v406_v52 = vpop.xlane.xlu1 %405 }
 0x7ff   :  { %v407_v53 = vsub.f32 %v403_v50, %v406_v52 }
 0x801   :  { %v408_v54 = vmul.f32 1.442695, %v407_v53 }
 0x803   :  { %1315 = vpow2.f32 %v408_v54 }
 0x809   :  { %v1316_v57 = vpop.eup %1315 }
 0x80a   :  { %v1629_v58 = vmul.f32 %v1316_v57, %v416_v55  ;;  %v410_v59 = vsel %vm123_vm1, %v1316_v57, 0.0 }
 0x80b   :  { %411 = vadd.xlane.f32.xlu2 %v410_v59 }
 0x80c   :  { %1262 = vmatmul.msk.f32.vlgmr.msrb.gmra.mxu0 %vm123_vm1, %v1629_v58 }
 0x80d   :  { %1005 = vmatpush.msrb.mxu0 %v1491_v41 }
 0x80f   :  { %1006 = vmatpush.msrb.mxu0 %v1498_v42 }
 0x87e   :  { %v412_v60 = vpop.xlane.xlu2 %411 }
 0x87f   :  { %1317 = vrcp.f32 %v412_v60  ;;  %v477_v1 = vand.u32 2147483648, %v412_v60  ;;  %v475_v4 = vand.u32 2147483647, %v412_v60  ;;  %vm471_vm5 = vweird.f32 %v412_v60 }
 0x881   :  { %v478_v8 = vor.u32 1.1754944e-38, %v477_v1  ;;  %vm476_vm7 = vcmp.eq.f32.partialorder %v475_v4, 8.507059e+37 }
 0x885   :  { %v1318_v61 = vpop.eup %1317 }
 0x886   :  { %v467_v62 = vmul.f32 %v1318_v61, %v412_v60  ;;  %vm472_vm4 = vweird.f32 %v1318_v61 }
 0x887   :  { %vm473_vm6 = vmor %vm471_vm5, %vm472_vm4 }
 0x888   :  { %v468_v63 = vsub.f32 1.0, %v467_v62 }
 0x889   :  { %v439_v10 = vpop.f32.mrf.mxu0 }
 0x88a   :  { %v469_v3 = vmul.f32 %v1318_v61, %v468_v63 }
 0x88c   :  { %v470_v5 = vadd.f32 %v1318_v61, %v469_v3 }
 0x88e   :  { %v474_v9 = vsel %vm473_vm6, %v1318_v61, %v470_v5 }
 0x88f   :  { %v1636_v11 = vsel %vm476_vm7, %v478_v8, %v474_v9 }
 0x890   :  { %v480_v12 = vmul.f32 %v1636_v11, %v439_v10 }
 0x892   :  { %v481_v14 = vadd.f32 %v480_v12, %v463_v13 }
 0x894   :  { %v482_v15 = vadd.f32 %v1552_v7, %v481_v14 }
 0x896   :  { %1319 = vtanh.f32 %v482_v15  ;;  %v1264_v17 = vmul.f32 -1.442695, %v482_v15 }
 0x898   :  { %1321 = vpow2.f32 %v1264_v17 }
 0x89c   :  { %v1320_v16 = vpop.eup %1319 }
 0x89d   :  { %505 = vrot.lane.b32.xlu0 %v1320_v16, %s1407_s17 }
 0x89e   :  { %v1322_v18 = vpop.eup %1321 }
 0x89f   :  { %v486_v19 = vadd.f32 1.0, %v1322_v18 }
 0x8a1   :  { %1323 = vrcp.f32 %v486_v19  ;;  %v498_v25 = vand.u32 2147483648, %v486_v19  ;;  %vm492_vm9 = vweird.f32 %v486_v19  ;;  %v496_v26 = vand.u32 2147483647, %v486_v19 }
 0x8a3   :  { %v499_v29 = vor.u32 1.1754944e-38, %v498_v25  ;;  %vm497_vm11 = vcmp.eq.f32.partialorder %v496_v26, 8.507059e+37 }
 0x8a7   :  { %v1324_v20 = vpop.eup %1323 }
 0x8a8   :  { %v488_v21 = vmul.f32 %v1324_v20, %v486_v19  ;;  %vm493_vm8 = vweird.f32 %v1324_v20 }
 0x8a9   :  { %vm494_vm10 = vmor %vm492_vm9, %vm493_vm8 }
 0x8aa   :  { %v489_v22 = vsub.f32 1.0, %v488_v21 }
 0x8ac   :  { %v490_v23 = vmul.f32 %v1324_v20, %v489_v22 }
 0x8ae   :  { %v491_v24 = vadd.f32 %v1324_v20, %v490_v23 }
 0x8b0   :  { %v495_v27 = vsel %vm494_vm10, %v1324_v20, %v491_v24 }
 0x8b1   :  { %v500_v33 = vsel %vm497_vm11, %v499_v29, %v495_v27 }
 0x8b2   :  { %v503_v35 = vmul.f32 %v500_v33, %v1605_v31 }
 0x90f   :  { %v506_v30 = vpop.permute.xlu0 %505 }
 0x910   :  { %v508_v34 = vmul.f32 %v506_v30, %v500_v33 }
 0x912   :  { %510 = vrot.lane.b32.xlu1 %v508_v34, %s1409_s19 }
 0x984   :  { %v511_v28 = vpop.permute.xlu1 %510 }
 0x985   :  { %v1643_v38 = vadd.f32 %v511_v28, %v503_v35 }
 0x987   :  { %1325 = vtanh.f32 %v1643_v38  ;;  %v534_v39 = vmul.f32 %v1459_v0, %v1643_v38 }
 0x989   :  { %536 = vrot.lane.b32.xlu1 %v534_v39, %s1407_s17 }
 0x98d   :  { %v1326_v40 = vpop.eup %1325 }
 0x98e   :  { %516 = vrot.lane.b32.xlu0 %v1326_v40, %s1407_s17 }
 0x9fb   :  { %v537_v31 = vpop.permute.xlu1 %536 }
 0xa00   :  { %v517_v47 = vpop.permute.xlu0 %516 }
 0xa01   :  { %v1650_v48 = vmul.f32 %v517_v47, %v500_v33 }
 0xa03   :  { %v533_v49 = vmul.f32 %v1650_v48, %v1570_v32 }
 0xa05   :  { %v539_v50 = vadd.f32 %v537_v31, %v533_v49 }
 0xa07   :  { %541 = vrot.lane.b32.xlu0 %v539_v50, %s1409_s19 }
 0xa0f   :  { %586 = vrot.lane.b32.xlu0 %v1650_v48, %s1409_s19 }
 0xa79   :  { %v542_v51 = vpop.permute.xlu0 %541 }
 0xa7a   :  { %v544_v52 = vsel %vm118_vm0, %v542_v51, 0.0 }
 0xa7b   :  { %545 = vadd.xlane.f32.xlu2 %v544_v52 }
 0xa81   :  { %v587_v53 = vpop.permute.xlu0 %586 }
 0xa82   :  { %1266 = vmatmul.msk.f32.vlgmr.msrb.gmra.mxu3 %vm118_vm0, %v587_v53 }
 0xa83   :  { %1170 = vmatpush.msrb.mxu3 %v1505_v43 }
 0xa85   :  { %1171 = vmatpush.msrb.mxu3 %v1510_v44 }
 0xa87   :  { %1172 = vmatpush.msrb.mxu3 %v1518_v45 }
 0xa89   :  { %1173 = vmatpush.msrb.mxu3 %v1527_v46 }
 0xa93   :  { %559 = vrot.lane.b32.xlu2 %v1466_v2, %s1408_s18 }
 0xaee   :  { %v546_v54 = vpop.xlane.xlu2 %545 }
 0xaef   :  { %v547_v55 = vadd.f32 %v546_v54, %v1484_v37 }
 0xaf1   :  { %v548_v57 = vsel %vm123_vm1, %v547_v55, -inf }
 0xaf2   :  { %549 = vmax.xlane.f32.xlu1 %v548_v57 }
 0xaf6   :  { %v560_v43 = vpop.permute.xlu2 %559 }
 0xb65   :  { %v550_v59 = vpop.xlane.xlu1 %549 }
 0xb66   :  { %v551_v60 = vsub.f32 %v547_v55, %v550_v59 }
 0xb68   :  { %v552_v61 = vmul.f32 1.442695, %v551_v60 }
 0xb6a   :  { %1327 = vpow2.f32 %v552_v61 }
 0xb70   :  { %v1328_v62 = vpop.eup %1327 }
 0xb71   :  { %v1667_v44 = vmul.f32 %v1328_v62, %v560_v43  ;;  %v554_v45 = vsel %vm123_vm1, %v1328_v62, 0.0 }
 0xb72   :  { %555 = vadd.xlane.f32.xlu0 %v554_v45 }
 0xb73   :  { %1265 = vmatmul.msk.f32.vlgmr.msrb.gmra.mxu1 %vm123_vm1, %v1667_v44 }
 0xb74   :  { %1148 = vmatpush.msrb.mxu1 %v1491_v41 }
 0xb76   :  { %1149 = vmatpush.msrb.mxu1 %v1498_v42  ;;  %v607_v42 = vpop.f32.mrf.mxu3 }
 0xbe5   :  { %v556_v46 = vpop.xlane.xlu0 %555 }
 0xbe6   :  { %1329 = vrcp.f32 %v556_v46  ;;  %v621_v4 = vand.u32 2147483648, %v556_v46  ;;  %v619_v8 = vand.u32 2147483647, %v556_v46  ;;  %vm615_vm13 = vweird.f32 %v556_v46 }
 0xbe8   :  { %v622_v10 = vor.u32 1.1754944e-38, %v621_v4  ;;  %vm620_vm15 = vcmp.eq.f32.partialorder %v619_v8, 8.507059e+37 }
 0xbec   :  { %v1330_v63 = vpop.eup %1329 }
 0xbed   :  { %v611_v1 = vmul.f32 %v1330_v63, %v556_v46  ;;  %vm616_vm12 = vweird.f32 %v1330_v63 }
 0xbee   :  { %vm617_vm14 = vmor %vm615_vm13, %vm616_vm12 }
 0xbef   :  { %v612_v3 = vsub.f32 1.0, %v611_v1 }
 0xbf0   :  { %v583_v13 = vpop.f32.mrf.mxu1 }
 0xbf1   :  { %v613_v5 = vmul.f32 %v1330_v63, %v612_v3 }
 0xbf3   :  { %v614_v9 = vadd.f32 %v1330_v63, %v613_v5 }
 0xbf5   :  { %v618_v12 = vsel %vm617_vm14, %v1330_v63, %v614_v9 }
 0xbf6   :  { %v1674_v14 = vsel %vm620_vm15, %v622_v10, %v618_v12 }
 0xbf7   :  { %v624_v41 = vmul.f32 %v1674_v14, %v583_v13 }
 0xbf9   :  { %v625_v15 = vadd.f32 %v624_v41, %v607_v42 }
 0xbfb   :  { %v626_v16 = vadd.f32 %v1552_v7, %v625_v15 }
 0xbfd   :  { %1331 = vtanh.f32 %v626_v16  ;;  %v1267_v18 = vmul.f32 -1.442695, %v626_v16 }
 0xbff   :  { %1333 = vpow2.f32 %v1267_v18 }
 0xc03   :  { %v1332_v17 = vpop.eup %1331 }
 0xc04   :  { %649 = vrot.lane.b32.xlu2 %v1332_v17, %s1407_s17 }
 0xc05   :  { %v1334_v19 = vpop.eup %1333 }
 0xc06   :  { %v630_v20 = vadd.f32 1.0, %v1334_v19 }
 0xc08   :  { %1335 = vrcp.f32 %v630_v20  ;;  %v642_v26 = vand.u32 2147483648, %v630_v20  ;;  %vm636_vm3 = vweird.f32 %v630_v20  ;;  %v640_v27 = vand.u32 2147483647, %v630_v20 }
 0xc0a   :  { %v643_v30 = vor.u32 1.1754944e-38, %v642_v26  ;;  %vm641_vm5 = vcmp.eq.f32.partialorder %v640_v27, 8.507059e+37 }
 0xc0e   :  { %v1336_v21 = vpop.eup %1335 }
 0xc0f   :  { %v632_v22 = vmul.f32 %v1336_v21, %v630_v20  ;;  %vm637_vm2 = vweird.f32 %v1336_v21 }
 0xc10   :  { %vm638_vm4 = vmor %vm636_vm3, %vm637_vm2 }
 0xc11   :  { %v633_v23 = vsub.f32 1.0, %v632_v22 }
 0xc13   :  { %v634_v24 = vmul.f32 %v1336_v21, %v633_v23 }
 0xc15   :  { %v635_v25 = vadd.f32 %v1336_v21, %v634_v24 }
 0xc17   :  { %v639_v29 = vsel %vm638_vm4, %v1336_v21, %v635_v25 }
 0xc18   :  { %v644_v34 = vsel %vm641_vm5, %v643_v30, %v639_v29 }
 0xc19   :  { %v647_v28 = vmul.f32 %v644_v34, %v1643_v38 }
 0xc5e   :  { %v650_v33 = vpop.permute.xlu2 %649 }
 0xc5f   :  { %v652_v35 = vmul.f32 %v650_v33, %v644_v34 }
 0xc61   :  { %654 = vrot.lane.b32.xlu2 %v652_v35, %s1409_s19 }
 0xcbb   :  { %v655_v39 = vpop.permute.xlu2 %654 }
 0xcbc   :  { %v1681_v40 = vadd.f32 %v655_v39, %v647_v28 }
 0xcbe   :  { %1337 = vtanh.f32 %v1681_v40  ;;  %v674_v47 = vmul.f32 %v1459_v0, %v1681_v40 }
 0xcc0   :  { %676 = vrot.lane.b32.xlu2 %v674_v47, %s1407_s17 }
 0xcc4   :  { %v1338_v49 = vpop.eup %1337 }
 0xcc5   :  { %660 = vrot.lane.b32.xlu1 %v1338_v49, %s1407_s17 }
 0xccd   :  { %699 = vrot.lane.b32.xlu1 %v1466_v2, %s1407_s17 }
 0xd1a   :  { %v677_v51 = vpop.permute.xlu2 %676 }
 0xd37   :  { %v661_v31 = vpop.permute.xlu1 %660 }
 0xd38   :  { %v1690_v50 = vmul.f32 %v661_v31, %v644_v34 }
 0xd3a   :  { %v673_v38 = vmul.f32 %v1690_v50, %v1570_v32 }
 0xd3c   :  { %v679_v52 = vadd.f32 %v677_v51, %v673_v38  ;;  %v1719_v38 = vld [vmem:[%s1891_s4] ss:$0 sm:$0xff] }
 0xd3e   :  { %681 = vrot.lane.b32.xlu2 %v679_v52, %s1409_s19 }
 0xd3f   :  { %v700_v43 = vpop.permute.xlu1 %699 }
 0xd98   :  { %v682_v53 = vpop.permute.xlu2 %681 }
 0xd99   :  { %v684_v0 = vsel %vm118_vm0, %v682_v53, 0.0 }
 0xd9a   :  { %685 = vadd.xlane.f32.xlu0 %v684_v0 }
 0xdae   :  { %727 = vrot.lane.b32.xlu0 %v1690_v50, %s1409_s19 }
 0xe0d   :  { %v686_v54 = vpop.xlane.xlu0 %685 }
 0xe0e   :  { %v687_v2 = vadd.f32 %v686_v54, %v1484_v37 }
 0xe10   :  { %v688_v55 = vsel %vm123_vm1, %v687_v2, -inf }
 0xe11   :  { %689 = vmax.xlane.f32.xlu2 %v688_v55 }
 0xe20   :  { %v728_v57 = vpop.permute.xlu0 %727 }
 0xe21   :  { %1269 = vmatmul.msk.f32.vlgmr.msra.gmra.mxu2 %vm118_vm0, %v728_v57 }
 0xe84   :  { %v690_v59 = vpop.xlane.xlu2 %689 }
 0xe85   :  { %v691_v60 = vsub.f32 %v687_v2, %v690_v59 }
 0xe87   :  { %v692_v61 = vmul.f32 1.442695, %v691_v60 }
 0xe89   :  { %1339 = vpow2.f32 %v692_v61 }
 0xe8f   :  { %v1340_v62 = vpop.eup %1339 }
 0xe90   :  { %v1701_v45 = vmul.f32 %v1340_v62, %v700_v43  ;;  %v694_v46 = vsel %vm123_vm1, %v1340_v62, 0.0  ;;  %v1388_v62 = vld [vmem:[%s1887_s0] sm:$0xff] }
 0xe91   :  { %695 = vadd.xlane.f32.xlu1 %v694_v46 }
 0xe92   :  { %1268 = vmatmul.msk.f32.vlgmr.msra.gmra.mxu0 %vm123_vm1, %v1701_v45 }
 0xea4   :  { %v748_v16 = vpop.f32.mrf.mxu2 }
 0xf04   :  { %v696_v63 = vpop.xlane.xlu1 %695 }
 0xf05   :  { %1341 = vrcp.f32 %v696_v63  ;;  %v762_v5 = vand.u32 2147483648, %v696_v63  ;;  %v760_v9 = vand.u32 2147483647, %v696_v63  ;;  %vm756_vm7 = vweird.f32 %v696_v63 }
 0xf07   :  { %v763_v12 = vor.u32 1.1754944e-38, %v762_v5  ;;  %vm761_vm9 = vcmp.eq.f32.partialorder %v760_v9, 8.507059e+37 }
 0xf0b   :  { %v1342_v1 = vpop.eup %1341 }
 0xf0c   :  { %v752_v3 = vmul.f32 %v1342_v1, %v696_v63  ;;  %vm757_vm6 = vweird.f32 %v1342_v1 }
 0xf0d   :  { %vm758_vm8 = vmor %vm756_vm7, %vm757_vm6 }
 0xf0e   :  { %v753_v4 = vsub.f32 1.0, %v752_v3 }
 0xf0f   :  { %v723_v41 = vpop.f32.mrf.mxu0 }
 0xf10   :  { %v754_v8 = vmul.f32 %v1342_v1, %v753_v4 }
 0xf12   :  { %v755_v10 = vadd.f32 %v1342_v1, %v754_v8 }
 0xf14   :  { %v759_v13 = vsel %vm758_vm8, %v1342_v1, %v755_v10 }
 0xf15   :  { %v1706_v42 = vsel %vm761_vm9, %v763_v12, %v759_v13 }
 0xf16   :  { %v765_v15 = vmul.f32 %v1706_v42, %v723_v41 }
 0xf18   :  { %v766_v17 = vadd.f32 %v765_v15, %v748_v16 }
 0xf1a   :  { %v767_v18 = vadd.f32 %v1552_v7, %v766_v17 }
 0xf1c   :  { %1343 = vtanh.f32 %v767_v18  ;;  %v1270_v20 = vmul.f32 -1.442695, %v767_v18 }
 0xf1e   :  { %1345 = vpow2.f32 %v1270_v20 }
 0xf22   :  { %v1344_v19 = vpop.eup %1343 }
 0xf23   :  { %790 = vrot.lane.b32.xlu0 %v1344_v19, %s1407_s17 }
 0xf24   :  { %v1346_v21 = vpop.eup %1345 }
 0xf25   :  { %v771_v22 = vadd.f32 1.0, %v1346_v21 }
 0xf27   :  { %1347 = vrcp.f32 %v771_v22  ;;  %v783_v29 = vand.u32 2147483648, %v771_v22  ;;  %vm777_vm11 = vweird.f32 %v771_v22  ;;  %v781_v30 = vand.u32 2147483647, %v771_v22 }
 0xf29   :  { %v784_v34 = vor.u32 1.1754944e-38, %v783_v29  ;;  %vm782_vm13 = vcmp.eq.f32.partialorder %v781_v30, 8.507059e+37 }
 0xf2d   :  { %v1348_v23 = vpop.eup %1347 }
 0xf2e   :  { %v773_v24 = vmul.f32 %v1348_v23, %v771_v22  ;;  %vm778_vm10 = vweird.f32 %v1348_v23 }
 0xf2f   :  { %vm779_vm12 = vmor %vm777_vm11, %vm778_vm10 }
 0xf30   :  { %v774_v25 = vsub.f32 1.0, %v773_v24 }
 0xf32   :  { %v775_v26 = vmul.f32 %v1348_v23, %v774_v25 }
 0xf34   :  { %v776_v27 = vadd.f32 %v1348_v23, %v775_v26 }
 0xf36   :  { %v780_v33 = vsel %vm779_vm12, %v1348_v23, %v776_v27 }
 0xf37   :  { %v785_v28 = vsel %vm782_vm13, %v784_v34, %v780_v33 }
 0xf38   :  { %v788_v47 = vmul.f32 %v785_v28, %v1681_v40 }
 0xf95   :  { %v791_v35 = vpop.permute.xlu0 %790 }
 0xf96   :  { %v793_v39 = vmul.f32 %v791_v35, %v785_v28 }
 0xf98   :  { %795 = vrot.lane.b32.xlu0 %v793_v39, %s1409_s19 }
0x100a   :  { %v796_v49 = vpop.permute.xlu0 %795 }
0x100b   :  { %v1713_v31 = vadd.f32 %v796_v49, %v788_v47 }
0x100d   :  { %1349 = vtanh.f32 %v1713_v31  ;;  %v818_v51 = vmul.f32 %v1719_v38, %v1713_v31 }
0x100f   :  { %820 = vrot.lane.b32.xlu2 %v818_v51, %s1407_s17 }
0x1013   :  { %v1350_v52 = vpop.eup %1349 }
0x1014   :  { %801 = vrot.lane.b32.xlu0 %v1350_v52, %s1407_s17 }
0x1069   :  { %v821_v54 = vpop.permute.xlu2 %820 }
0x1086   :  { %v802_v53 = vpop.permute.xlu0 %801 }
0x1087   :  { %v804_v40 = vmul.f32 %v802_v53, %v785_v28 }
0x1089   :  { %v817_v0 = vmul.f32 %v804_v40, %v1570_v32  ;;  %813 = vrot.lane.b32.xlu2 %v804_v40, %s1409_s19 }
0x108b   :  { %v823_v2 = vadd.f32 %v821_v54, %v817_v0 }
0x108d   :  { %825 = vrot.lane.b32.xlu0 %v823_v2, %s1409_s19 }
0x10e3   :  { %v814_v55 = vpop.permute.xlu2 %813 }
0x10e4   :  { %816 = vst.msk [vmem:[%s1894_s7 + $0x8] sm:$0xff] %vm118_vm0, %v814_v55  ;;  %1272 = vmatmul.msk.f32.vlgmr.msra.gmra.mxu3 %vm118_vm0, %v814_v55 }
0x10ff   :  { %v826_v57 = vpop.permute.xlu0 %825 }
0x1100   :  { %v828_v59 = vsel %vm118_vm0, %v826_v57, 0.0 }
0x1101   :  { %829 = vadd.xlane.f32.xlu0 %v828_v59 }
0x1167   :  { %v889_v23 = vpop.f32.mrf.mxu3 }
0x1174   :  { %v830_v60 = vpop.xlane.xlu0 %829 }
0x1175   :  { %v831_v61 = vadd.f32 %v830_v60, %v1484_v37 }
0x1177   :  { %v832_v43 = vsel %vm123_vm1, %v831_v61, -inf }
0x1178   :  { %833 = vmax.xlane.f32.xlu1 %v832_v43 }
0x1191   :  { %843 = vrot.lane.b32.xlu1 %v1388_v62, %s1410_s20 }
0x11eb   :  { %v834_v46 = vpop.xlane.xlu1 %833 }
0x11ec   :  { %v835_v63 = vsub.f32 %v831_v61, %v834_v46 }
0x11ee   :  { %v836_v1 = vmul.f32 1.442695, %v835_v63 }
0x11f0   :  { %1351 = vpow2.f32 %v836_v1  ;;  %v1771_v1 = vld [vmem:[%s1887_s0] sm:$0xff] }
0x11f6   :  { %v1352_v3 = vpop.eup %1351 }
0x11f7   :  { %v838_v4 = vsel %vm123_vm1, %v1352_v3, 0.0 }
0x11f8   :  { %839 = vadd.xlane.f32.xlu2 %v838_v4 }
0x1203   :  { %v844_v5 = vpop.permute.xlu1 %843 }
0x1204   :  { %v1741_v8 = vmul.f32 %v1352_v3, %v844_v5 }
0x1206   :  { %1271 = vmatmul.msk.f32.vlgmr.msra.gmra.mxu1 %vm123_vm1, %v1741_v8 }
0x126b   :  { %v840_v9 = vpop.xlane.xlu2 %839 }
0x126c   :  { %1353 = vrcp.f32 %v840_v9  ;;  %v903_v16 = vand.u32 2147483648, %v840_v9  ;;  %vm897_vm15 = vweird.f32 %v840_v9  ;;  %v901_v17 = vand.u32 2147483647, %v840_v9 }
0x126e   :  { %v904_v19 = vor.u32 1.1754944e-38, %v903_v16  ;;  %vm902_vm3 = vcmp.eq.f32.partialorder %v901_v17, 8.507059e+37 }
0x1272   :  { %v1354_v10 = vpop.eup %1353 }
0x1273   :  { %v893_v12 = vmul.f32 %v1354_v10, %v840_v9  ;;  %vm898_vm14 = vweird.f32 %v1354_v10 }
0x1274   :  { %vm899_vm2 = vmor %vm897_vm15, %vm898_vm14 }
0x1275   :  { %v894_v13 = vsub.f32 1.0, %v893_v12 }
0x1277   :  { %v895_v41 = vmul.f32 %v1354_v10, %v894_v13 }
0x1279   :  { %v896_v15 = vadd.f32 %v1354_v10, %v895_v41 }
0x127b   :  { %v900_v18 = vsel %vm899_vm2, %v1354_v10, %v896_v15 }
0x127c   :  { %v1745_v21 = vsel %vm902_vm3, %v904_v19, %v900_v18 }
0x1283   :  { %v867_v20 = vpop.f32.mrf.mxu1 }
0x1284   :  { %v906_v22 = vmul.f32 %v1745_v21, %v867_v20 }
0x1286   :  { %v907_v24 = vadd.f32 %v906_v22, %v889_v23 }
0x1288   :  { %v908_v25 = vadd.f32 %v1552_v7, %v907_v24 }
0x128a   :  { %1355 = vtanh.f32 %v908_v25  ;;  %v1273_v27 = vmul.f32 -1.442695, %v908_v25 }
0x128c   :  { %1357 = vpow2.f32 %v1273_v27 }
0x1290   :  { %v1356_v26 = vpop.eup %1355 }
0x1291   :  { %931 = vrot.lane.b32.xlu1 %v1356_v26, %s1407_s17 }
0x1292   :  { %v1358_v29 = vpop.eup %1357 }
0x1293   :  { %v912_v30 = vadd.f32 1.0, %v1358_v29 }
0x1295   :  { %1359 = vrcp.f32 %v912_v30  ;;  %v924_v47 = vand.u32 2147483648, %v912_v30  ;;  %vm918_vm5 = vweird.f32 %v912_v30  ;;  %v922_v49 = vand.u32 2147483647, %v912_v30 }
0x1297   :  { %v925_v51 = vor.u32 1.1754944e-38, %v924_v47  ;;  %vm923_vm7 = vcmp.eq.f32.partialorder %v922_v49, 8.507059e+37 }
0x129b   :  { %v1360_v33 = vpop.eup %1359 }
0x129c   :  { %v914_v34 = vmul.f32 %v1360_v33, %v912_v30  ;;  %vm919_vm4 = vweird.f32 %v1360_v33 }
0x129d   :  { %vm920_vm6 = vmor %vm918_vm5, %vm919_vm4 }
0x129e   :  { %v915_v35 = vsub.f32 1.0, %v914_v34 }
0x12a0   :  { %v916_v28 = vmul.f32 %v1360_v33, %v915_v35 }
0x12a2   :  { %v917_v39 = vadd.f32 %v1360_v33, %v916_v28  ;;  %v1788_v28 = vld [vmem:[%s1890_s3] ss:$0 sm:$0xff] }
0x12a4   :  { %v921_v7 = vsel %vm920_vm6, %v1360_v33, %v917_v39 }
0x12a5   :  { %v926_v53 = vsel %vm923_vm7, %v925_v51, %v921_v7 }
0x12a6   :  { %v929_v0 = vmul.f32 %v926_v53, %v1713_v31 }
0x1303   :  { %v932_v52 = vpop.permute.xlu1 %931 }
0x1304   :  { %v934_v40 = vmul.f32 %v932_v52, %v926_v53 }
0x1306   :  { %936 = vrot.lane.b32.xlu0 %v934_v40, %s1409_s19 }
0x1378   :  { %v937_v54 = vpop.permute.xlu0 %936 }
0x1379   :  { %v1752_v2 = vadd.f32 %v937_v54, %v929_v0 }
0x137b   :  { %1361 = vtanh.f32 %v1752_v2  ;;  %v959_v57 = vmul.f32 %v1719_v38, %v1752_v2 }
0x1381   :  { %v1362_v55 = vpop.eup %1361 }
0x1382   :  { %942 = vrot.lane.b32.xlu1 %v1362_v55, %s1407_s17 }
0x138a   :  { %961 = vrot.lane.b32.xlu1 %v959_v57, %s1407_s17 }
0x13f4   :  { %v943_v59 = vpop.permute.xlu1 %942 }
0x13f5   :  { %v1759_v60 = vmul.f32 %v943_v59, %v926_v53 }
0x13f7   :  { %v958_v61 = vmul.f32 %v1759_v60, %v1570_v32 }
0x13fc   :  { %v962_v31 = vpop.permute.xlu1 %961 }
0x13fd   :  { %v964_v43 = vadd.f32 %v962_v31, %v958_v61 }
0x13ff   :  { %966 = vrot.lane.b32.xlu2 %v964_v43, %s1409_s19 }
0x1407   :  { %1011 = vrot.lane.b32.xlu2 %v1759_v60, %s1409_s19 }
0x140f   :  { %984 = vrot.lane.b32.xlu2 %v1771_v1, %s1409_s19 }
0x1459   :  { %v967_v62 = vpop.permute.xlu2 %966 }
0x145a   :  { %v969_v46 = vsel %vm118_vm0, %v967_v62, 0.0 }
0x145b   :  { %970 = vadd.xlane.f32.xlu0 %v969_v46 }
0x1461   :  { %v1012_v63 = vpop.permute.xlu2 %1011 }
0x1462   :  { %1275 = vmatmul.msk.f32.vlgmr.msrb.gmra.mxu2 %vm118_vm0, %v1012_v63 }
0x1469   :  { %v985_v13 = vpop.permute.xlu2 %984 }
0x14ce   :  { %v971_v3 = vpop.xlane.xlu0 %970 }
0x14cf   :  { %v972_v4 = vadd.f32 %v971_v3, %v1484_v37 }
0x14d1   :  { %v973_v5 = vsel %vm123_vm1, %v972_v4, -inf }
0x14d2   :  { %974 = vmax.xlane.f32.xlu1 %v973_v5 }
0x14e5   :  { %v1032_v34 = vpop.f32.mrf.mxu2 }
0x1545   :  { %v975_v9 = vpop.xlane.xlu1 %974 }
0x1546   :  { %v976_v10 = vsub.f32 %v972_v4, %v975_v9 }
0x1548   :  { %v977_v12 = vmul.f32 1.442695, %v976_v10 }
0x154a   :  { %1363 = vpow2.f32 %v977_v12 }
0x1550   :  { %v1364_v41 = vpop.eup %1363 }
0x1551   :  { %v1777_v15 = vmul.f32 %v1364_v41, %v985_v13  ;;  %v979_v16 = vsel %vm123_vm1, %v1364_v41, 0.0 }
0x1552   :  { %980 = vadd.xlane.f32.xlu2 %v979_v16 }
0x1553   :  { %1274 = vmatmul.msk.f32.vlgmr.msrb.gmra.mxu0 %vm123_vm1, %v1777_v15 }
0x15c5   :  { %v981_v17 = vpop.xlane.xlu2 %980 }
0x15c6   :  { %1365 = vrcp.f32 %v981_v17  ;;  %v1046_v22 = vand.u32 2147483648, %v981_v17  ;;  %v1044_v24 = vand.u32 2147483647, %v981_v17  ;;  %vm1040_vm9 = vweird.f32 %v981_v17 }
0x15c8   :  { %v1047_v26 = vor.u32 1.1754944e-38, %v1046_v22  ;;  %vm1045_vm11 = vcmp.eq.f32.partialorder %v1044_v24, 8.507059e+37 }
0x15cc   :  { %v1366_v18 = vpop.eup %1365 }
0x15cd   :  { %v1036_v19 = vmul.f32 %v1366_v18, %v981_v17  ;;  %vm1041_vm8 = vweird.f32 %v1366_v18 }
0x15ce   :  { %vm1042_vm10 = vmor %vm1040_vm9, %vm1041_vm8  ;;  %vm531_vm9 = vcmask 785920  }
0x15cf   :  { %v1037_v20 = vsub.f32 1.0, %v1036_v19 }
0x15d0   :  { %v1008_v29 = vpop.f32.mrf.mxu0 }
0x15d1   :  { %v1038_v23 = vmul.f32 %v1366_v18, %v1037_v20 }
0x15d3   :  { %v1039_v25 = vadd.f32 %v1366_v18, %v1038_v23 }
0x15d5   :  { %v1043_v27 = vsel %vm1042_vm10, %v1366_v18, %v1039_v25  ;;  %vm671_vm10 = vcmask 1048320  }
0x15d6   :  { %v1782_v30 = vsel %vm1045_vm11, %v1047_v26, %v1043_v27  ;;  %vm381_vm11 = vcmask 261248  }
0x15d7   :  { %v1049_v33 = vmul.f32 %v1782_v30, %v1008_v29 }
0x15d9   :  { %v1050_v35 = vadd.f32 %v1049_v33, %v1032_v34 }
0x15db   :  { %v1051_v39 = vadd.f32 %v1788_v28, %v1050_v35 }
0x15dd   :  { %1367 = vtanh.f32 %v1051_v39  ;;  %v1276_v49 = vmul.f32 -1.442695, %v1051_v39 }
0x15df   :  { %1369 = vpow2.f32 %v1276_v49 }
0x15e3   :  { %v1368_v47 = vpop.eup %1367 }
0x15e4   :  { %1074 = vrot.lane.b32.xlu0 %v1368_v47, %s1407_s17 }
0x15e5   :  { %v1370_v7 = vpop.eup %1369 }
0x15e6   :  { %v1055_v51 = vadd.f32 1.0, %v1370_v7 }
0x15e8   :  { %1371 = vrcp.f32 %v1055_v51  ;;  %v1067_v55 = vand.u32 2147483648, %v1055_v51  ;;  %vm1061_vm13 = vweird.f32 %v1055_v51  ;;  %v1065_v57 = vand.u32 2147483647, %v1055_v51 }
0x15ea   :  { %v1068_v61 = vor.u32 1.1754944e-38, %v1067_v55  ;;  %vm1066_vm15 = vcmp.eq.f32.partialorder %v1065_v57, 8.507059e+37  ;;  %v520_v57 = vmul.f32 %v1636_v11, %v1629_v58 }
0x15ee   :  { %v1372_v52 = vpop.eup %1371 }
0x15ef   :  { %v1057_v53 = vmul.f32 %v1372_v52, %v1055_v51  ;;  %vm1062_vm12 = vweird.f32 %v1372_v52 }
0x15f0   :  { %vm1063_vm14 = vmor %vm1061_vm13, %vm1062_vm12  ;;  %vm525_vm12 = vcmask 392448   ;;  %vm669_vm13 = vcmask 523648  }
0x15f1   :  { %v1058_v40 = vsub.f32 1.0, %v1057_v53 }
0x15f3   :  { %v1059_v0 = vmul.f32 %v1372_v52, %v1058_v40 }
0x15f5   :  { %v1060_v54 = vadd.f32 %v1372_v52, %v1059_v0 }
0x15f7   :  { %v1064_v59 = vsel %vm1063_vm14, %v1372_v52, %v1060_v54  ;;  %vm810_vm14 = vcmask 654848  }
0x15f8   :  { %v1069_v43 = vsel %vm1066_vm15, %v1068_v61, %v1064_v59  ;;  %v805_v59 = vmul.f32 %v1706_v42, %v1701_v45  ;;  %vm951_vm15 = vcmask 786048  }
0x15f9   :  { %v1072_v46 = vmul.f32 %v1069_v43, %v1752_v2 }
0x1656   :  { %v1075_v31 = vpop.permute.xlu0 %1074 }
0x1657   :  { %v1077_v62 = vmul.f32 %v1075_v31, %v1069_v43 }
0x1659   :  { %1079 = vrot.lane.b32.xlu1 %v1077_v62, %s1409_s19 }
0x16cb   :  { %v1080_v63 = vpop.permute.xlu1 %1079 }
0x16cc   :  { %v1794_v3 = vadd.f32 %v1080_v63, %v1072_v46 }
0x16ce   :  { %1373 = vtanh.f32 %v1794_v3  ;;  %v1102_v4 = vmul.f32 %v1719_v38, %v1794_v3 }
0x16d0   :  { %1104 = vrot.lane.b32.xlu1 %v1102_v4, %s1407_s17 }
0x16d4   :  { %v1374_v5 = vpop.eup %1373 }
0x16d5   :  { %1085 = vrot.lane.b32.xlu0 %v1374_v5, %s1407_s17 }
0x1742   :  { %v1105_v2 = vpop.permute.xlu1 %1104 }
0x1747   :  { %v1086_v9 = vpop.permute.xlu0 %1085 }
0x1748   :  { %v1088_v10 = vmul.f32 %v1086_v9, %v1069_v43 }
0x174a   :  { %v1101_v12 = vmul.f32 %v1088_v10, %v1570_v32  ;;  %1154 = vrot.lane.b32.xlu2 %v1088_v10, %s1409_s19 }
0x174c   :  { %v1107_v13 = vadd.f32 %v1105_v2, %v1101_v12  ;;  %v664_v2 = vmul.f32 %v1674_v14, %v1667_v44 }
0x174e   :  { %1109 = vrot.lane.b32.xlu0 %v1107_v13, %s1409_s19 }
0x1752   :  { %1127 = vrot.lane.b32.xlu2 %v1771_v1, %s1411_s21 }
0x17a4   :  { %v1155_v41 = vpop.permute.xlu2 %1154 }
0x17a5   :  { %1278 = vmatmul.msk.f32.vlgmr.msrb.gmra.mxu3 %vm118_vm0, %v1155_v41  ;;  %v946_v41 = vmul.f32 %v1745_v21, %v1741_v8 }
0x17ac   :  { %v1128_v23 = vpop.permute.xlu2 %1127 }
0x17c0   :  { %v1110_v38 = vpop.permute.xlu0 %1109 }
0x17c1   :  { %v1112_v16 = vsel %vm118_vm0, %v1110_v38, 0.0  ;;  %vm387_vm0 = vcmask 523520  }
0x17c2   :  { %1113 = vadd.xlane.f32.xlu1 %v1112_v16 }
0x1828   :  { %v1175_v40 = vpop.f32.mrf.mxu3 }
0x1835   :  { %v1114_v17 = vpop.xlane.xlu1 %1113 }
0x1836   :  { %v1115_v18 = vadd.f32 %v1114_v17, %v1484_v37 }
0x1838   :  { %v1116_v32 = vsel %vm123_vm1, %v1115_v18, -inf }
0x1839   :  { %1117 = vmax.xlane.f32.xlu0 %v1116_v32 }
0x18ac   :  { %v1118_v19 = vpop.xlane.xlu0 %1117 }
0x18ad   :  { %v1119_v20 = vsub.f32 %v1115_v18, %v1118_v19 }
0x18af   :  { %v1120_v22 = vmul.f32 1.442695, %v1119_v20 }
0x18b1   :  { %1375 = vpow2.f32 %v1120_v22 }
0x18b7   :  { %v1376_v24 = vpop.eup %1375 }
0x18b8   :  { %v1130_v1 = vmul.f32 %v1376_v24, %v1128_v23  ;;  %v1122_v25 = vsel %vm123_vm1, %v1376_v24, 0.0 }
0x18b9   :  { %1123 = vadd.xlane.f32.xlu2 %v1122_v25 }
0x18ba   :  { %1277 = vmatmul.msk.f32.vlgmr.msrb.gmra.mxu1 %vm123_vm1, %v1130_v1 }
0x18d1   :  { %384 = vrot.lane.b32.xlu2 %v1612_v36, %s1407_s17 }
0x192c   :  { %v1124_v26 = vpop.xlane.xlu2 %1123 }
0x192d   :  { %1377 = vrcp.f32 %v1124_v26  ;;  %v1189_v34 = vand.u32 2147483648, %v1124_v26  ;;  %v1187_v39 = vand.u32 2147483647, %v1124_v26  ;;  %vm1183_vm1 = vweird.f32 %v1124_v26 }
0x192f   :  { %v1190_v36 = vor.u32 1.1754944e-38, %v1189_v34  ;;  %vm1188_vm4 = vcmp.eq.f32.partialorder %v1187_v39, 8.507059e+37 }
0x1933   :  { %v1378_v37 = vpop.eup %1377 }
0x1934   :  { %v1179_v27 = vmul.f32 %v1378_v37, %v1124_v26  ;;  %v385_v29 = vpop.permute.xlu2 %384  ;;  %vm1184_vm2 = vweird.f32 %v1378_v37 }
0x1935   :  { %388 = vst.msk [vmem:[%s1894_s7] sm:$0xff] %vm387_vm0, %v385_v29  ;;  %vm1185_vm3 = vmor %vm1183_vm1, %vm1184_vm2  ;;  %vm1237_vm2 = vcmask 1048448  }
0x1936   :  { %v1180_v33 = vsub.f32 1.0, %v1179_v27 }
0x1937   :  { %v1151_v7 = vpop.f32.mrf.mxu1 }
0x1938   :  { %v1181_v35 = vmul.f32 %v1378_v37, %v1180_v33 }
0x193a   :  { %v1182_v47 = vadd.f32 %v1378_v37, %v1181_v35 }
0x193c   :  { %v1186_v49 = vsel %vm1185_vm3, %v1378_v37, %v1182_v47 }
0x193d   :  { %v1191_v51 = vsel %vm1188_vm4, %v1190_v36, %v1186_v49 }
0x193e   :  { %v1192_v52 = vmul.f32 %v1191_v51, %v1151_v7  ;;  %v1232_v53 = vmul.f32 %v1191_v51, %v1130_v1 }
0x1940   :  { %v1193_v0 = vadd.f32 %v1192_v52, %v1175_v40  ;;  %1234 = vrot.lane.b32.xlu2 %v1232_v53, %s1406_s16 }
0x1942   :  { %v1194_v54 = vadd.f32 %v1788_v28, %v1193_v0 }
0x1944   :  { %1379 = vtanh.f32 %v1194_v54  ;;  %v1279_v28 = vmul.f32 -1.442695, %v1194_v54 }
0x1946   :  { %1381 = vpow2.f32 %v1279_v28 }
0x194a   :  { %v1380_v55 = vpop.eup %1379 }
0x194b   :  { %1217 = vrot.lane.b32.xlu1 %v1380_v55, %s1407_s17 }
0x194c   :  { %v1382_v61 = vpop.eup %1381 }
0x194d   :  { %v1198_v31 = vadd.f32 1.0, %v1382_v61 }
0x194f   :  { %1383 = vrcp.f32 %v1198_v31  ;;  %v1210_v42 = vand.u32 2147483648, %v1198_v31  ;;  %vm1204_vm6 = vweird.f32 %v1198_v31  ;;  %v1208_v46 = vand.u32 2147483647, %v1198_v31 }
0x1951   :  { %v1211_v63 = vor.u32 1.1754944e-38, %v1210_v42  ;;  %vm1209_vm8 = vcmp.eq.f32.partialorder %v1208_v46, 8.507059e+37 }
0x1953   :  { %522 = vrot.lane.b32.xlu1 %v520_v57, %s1409_s19 }
0x1955   :  { %v1384_v58 = vpop.eup %1383 }
0x1956   :  { %v1200_v11 = vmul.f32 %v1384_v58, %v1198_v31  ;;  %vm1205_vm5 = vweird.f32 %v1384_v58 }
0x1957   :  { %vm1206_vm7 = vmor %vm1204_vm6, %vm1205_vm5 }
0x1958   :  { %v1201_v43 = vsub.f32 1.0, %v1200_v11 }
0x195a   :  { %v1202_v62 = vmul.f32 %v1384_v58, %v1201_v43 }
0x195b   :  { %807 = vrot.lane.b32.xlu1 %v805_v59, %s1407_s17 }
0x195c   :  { %v1203_v45 = vadd.f32 %v1384_v58, %v1202_v62 }
0x1963   :  { %954 = vrot.lane.b32.xlu1 %v1759_v60, %s1407_s17  ;;  %v1207_v60 = vsel %vm1206_vm7, %v1384_v58, %v1203_v45 }
0x1964   :  { %v1212_v4 = vsel %vm1209_vm8, %v1211_v63, %v1207_v60 }
0x1965   :  { %v1215_v44 = vmul.f32 %v1212_v4, %v1794_v3 }
0x196b   :  { %528 = vrot.lane.b32.xlu1 %v1650_v48, %s1405_s10 }
0x1973   :  { %1097 = vrot.lane.b32.xlu1 %v1088_v10, %s1405_s10  ;;  %v376_v10 = vmul.f32 %v1598_v6, %v1590_v56 }
0x19bd   :  { %v1218_v48 = vpop.permute.xlu1 %1217 }
0x19be   :  { %v1220_v5 = vmul.f32 %v1218_v48, %v1212_v4 }
0x19c0   :  { %1222 = vrot.lane.b32.xlu0 %v1220_v5, %s1409_s19 }
0x19c5   :  { %v523_v9 = vpop.permute.xlu1 %522 }
0x19c8   :  { %378 = vrot.lane.b32.xlu0 %v376_v10, %s1411_s21 }
0x19cd   :  { %v808_v12 = vpop.permute.xlu1 %807 }
0x19d0   :  { %666 = vrot.lane.b32.xlu0 %v664_v2, %s1410_s20 }
0x19d5   :  { %v955_v13 = vpop.permute.xlu1 %954 }
0x19d6   :  { %957 = vst.msk [vmem:[%s1894_s7 + $0x8] sm:$0xff] %vm387_vm0, %v955_v13  ;;  %vm1094_vm0 = vcmask 917248  }
0x19d8   :  { %948 = vrot.lane.b32.xlu0 %v946_v41, %s1408_s18 }
0x19dd   :  { %v529_v56 = vpop.permute.xlu1 %528 }
0x19de   :  { %532 = vst.msk [vmem:[%s1894_s7] sm:$0xff] %vm531_vm9, %v529_v56 }
0x19df   :  { %672 = vst.msk [vmem:[%s1894_s7] sm:$0xff] %vm671_vm10, %v1690_v50  ;;  %v1089_v50 = vmul.f32 %v1782_v30, %v1777_v15  ;;  %v1235_v30 = vpop.permute.xlu2 %1234 }
0x19e5   :  { %v1098_v6 = vpop.permute.xlu1 %1097 }
0x19e6   :  { %1100 = vst.msk [vmem:[%s1894_s7 + $0x8] sm:$0xff] %vm531_vm9, %v1098_v6 }
0x1a32   :  { %v1223_v14 = vpop.permute.xlu0 %1222 }
0x1a33   :  { %v1225_v8 = vadd.f32 %v1223_v14, %v1215_v44 }
0x1a35   :  { %1385 = vtanh.f32 %v1225_v8 }
0x1a3a   :  { %v379_v21 = vpop.permute.xlu0 %378 }
0x1a3b   :  { %v1386_v38 = vpop.eup %1385  ;;  %382 = vst.msk [vmem:[%s1893_s6] sm:$0xff] %vm381_vm11, %v379_v21 }
0x1a3c   :  { %1228 = vrot.lane.b32.xlu0 %v1386_v38, %s1407_s17  ;;  %526 = vst.msk [vmem:[%s1893_s6] sm:$0xff] %vm525_vm12, %v523_v9 }
0x1a42   :  { %v667_v3 = vpop.permute.xlu0 %666 }
0x1a43   :  { %670 = vst.msk [vmem:[%s1893_s6] sm:$0xff] %vm669_vm13, %v667_v3 }
0x1a44   :  { %1091 = vrot.lane.b32.xlu0 %v1089_v50, %s1405_s10  ;;  %811 = vst.msk [vmem:[%s1893_s6] sm:$0xff] %vm810_vm14, %v808_v12 }
0x1a4a   :  { %v949_v16 = vpop.permute.xlu0 %948 }
0x1a4b   :  { %952 = vst.msk [vmem:[%s1893_s6] sm:$0xff] %vm951_vm15, %v949_v16 }
0x1aae   :  { %v1229_v17 = vpop.permute.xlu0 %1228 }
0x1aaf   :  { %v1231_v18 = vmul.f32 %v1229_v17, %v1212_v4 }
0x1ab1   :  { %1239 = vst.msk [vmem:[%s1894_s7 + $0x8] sm:$0xff] %vm671_vm10, %v1231_v18 }
0x1ab6   :  { %v1092_v15 = vpop.permute.xlu0 %1091 }
0x1ab7   :  { %1095 = vst.msk [vmem:[%s1893_s6] sm:$0xff] %vm1094_vm0, %v1092_v15 }
0x1ab8   :  { %1238 = vst.msk [vmem:[%s1893_s6] sm:$0xff] %vm1237_vm2, %v1235_v30 }
0x1ab9   :  { %1248 = vsyncpa [#allocation3], 1 }

</bundles_post_ra>
